<compile_context>
chip_gen: v7x
topology: tpu7x:2x2x1
jax: 0.10.0
libtpu: 0.0.40
codegen_flags: <defaults>
</compile_context>

<pallas_src>
import functools

import jax
import jax.numpy as jnp
from jax import lax
from jax.experimental import pallas as pl
from jax.experimental.pallas import tpu as pltpu

EXPANSION = 4
BN_EPS = 1e-5
VMEM_LIMIT = 40 * 1024 * 1024          # fits v7x's 64 MiB/TC with headroom
VMEM_BUDGET = 24 * 1024 * 1024         # tile-picker budget under the limit above


# ---------------------------------------------------------------------------
# Pallas kernels
# ---------------------------------------------------------------------------
def _matmul_bias_act_kernel(x_ref, w_ref, b_ref, o_ref, *, apply_relu):
    acc = jnp.dot(x_ref[...], w_ref[...], preferred_element_type=jnp.float32)
    out = acc + b_ref[...]
    if apply_relu:
        out = jnp.maximum(out, 0.0)
    o_ref[...] = out.astype(o_ref.dtype)


def _matmul_bias_res_act_kernel(x_ref, w_ref, b_ref, r_ref, o_ref, *, apply_relu):
    acc = jnp.dot(x_ref[...], w_ref[...], preferred_element_type=jnp.float32)
    out = acc + b_ref[...] + r_ref[...].astype(jnp.float32)
    if apply_relu:
        out = jnp.maximum(out, 0.0)
    o_ref[...] = out.astype(o_ref.dtype)


def _conv3x3_bn_relu_kernel(x_ref, w_ref, b_ref, o_ref, *, Ho, Wo, stride, C):
    """In-kernel 9-tap accumulation for a 3x3 conv (+ folded BN bias + ReLU).

    x_ref: (n_phases, Hp2, Wp2, C)  padded (phase-decomposed) activation, one batch elem
    w_ref: (9*C, tn)                folded weight, (kh, kw, ci) row ordering
    b_ref: (1, tn)                  folded bias (f32)
    o_ref: (1, Ho*Wo, tn)
    """
    tn = o_ref.shape[-1]
    acc = jnp.zeros((Ho * Wo, tn), jnp.float32)
    for kh in range(3):
        for kw in range(3):
            p = (kh % stride) * stride + (kw % stride)
            oh, ow = kh // stride, kw // stride
            patch = x_ref[p, oh:oh + Ho, ow:ow + Wo, :].reshape(Ho * Wo, C)
            t = kh * 3 + kw
            acc = acc + jnp.dot(patch, w_ref[t * C:(t + 1) * C, :],
                                preferred_element_type=jnp.float32)
    out = jnp.maximum(acc + b_ref[...], 0.0)
    o_ref[0] = out.astype(o_ref.dtype)


# ---------------------------------------------------------------------------
# Fused (X @ W_folded) + bias [+ residual] [-> ReLU], tiled over M and N
# ---------------------------------------------------------------------------
def _round_up(x, m):
    return ((x + m - 1) // m) * m


def _pick_tile_m(M, K, tn, has_residual):
    """Largest M tile (<=512) whose VMEM footprint (incl. f32 epilogue) fits budget."""
    if M < 128:
        return _round_up(max(M, 1), 8)
    cap = _round_up(M, 128)
    for tm in (512, 256, 128):
        if tm > cap:
            continue
        need = 2 * tm * K * 2          # x tile (double-buffered, bf16)
        need += 2 * K * tn * 2         # weight tile (double-buffered, bf16)
        need += 2 * tm * tn * 2        # output tile (double-buffered, bf16)
        need += 2 * tn * 4             # bias (f32)
        need += 2 * tm * tn * 4        # f32 epilogue intermediates (acc + out)
        if has_residual:
            need += 2 * tm * tn * 2    # residual tile (bf16)
        if need <= VMEM_BUDGET:
            return tm
    return 128


def fused_matmul_bias_act(x2d, w2d, bias, residual=None, apply_relu=True,
                          out_dtype=jnp.bfloat16):
    """y = [relu]((x2d @ w2d) + bias [+ residual]); w2d already has BN scale folded in."""
    M, K = x2d.shape
    K2, N = w2d.shape
    assert K == K2

    x2d = x2d.astype(jnp.bfloat16)
    w2d = w2d.astype(jnp.bfloat16)
    bias2 = bias.reshape(1, N).astype(jnp.float32)
    if residual is not None:
        residual = residual.astype(jnp.bfloat16)

    tn = min(512, N)
    assert N % tn == 0
    tm = _pick_tile_m(M, K, tn, residual is not None)
    Mp = _round_up(M, tm)
    if Mp != M:
        x2d = jnp.pad(x2d, ((0, Mp - M), (0, 0)))
        if residual is not None:
            residual = jnp.pad(residual, ((0, Mp - M), (0, 0)))
    grid = (Mp // tm, N // tn)

    x_spec = pl.BlockSpec((tm, K), lambda i, j: (i, 0))
    w_spec = pl.BlockSpec((K, tn), lambda i, j: (0, j))
    b_spec = pl.BlockSpec((1, tn), lambda i, j: (0, j))
    o_spec = pl.BlockSpec((tm, tn), lambda i, j: (i, j))
    out_shape = jax.ShapeDtypeStruct((Mp, N), out_dtype)
    cparams = pltpu.CompilerParams(
        dimension_semantics=("parallel", "parallel"),
        vmem_limit_bytes=VMEM_LIMIT,
    )
    bytes_accessed = Mp * K * 2 + K * N * 2 + N * 4 + Mp * N * 2
    if residual is not None:
        bytes_accessed += Mp * N * 2
    cost = pl.CostEstimate(flops=2 * Mp * K * N, transcendentals=0,
                           bytes_accessed=bytes_accessed)

    if residual is None:
        out = pl.pallas_call(
            functools.partial(_matmul_bias_act_kernel, apply_relu=apply_relu),
            out_shape=out_shape,
            grid=grid,
            in_specs=[x_spec, w_spec, b_spec],
            out_specs=o_spec,
            compiler_params=cparams,
            cost_estimate=cost,
        )(x2d, w2d, bias2)
    else:
        out = pl.pallas_call(
            functools.partial(_matmul_bias_res_act_kernel, apply_relu=apply_relu),
            out_shape=out_shape,
            grid=grid,
            in_specs=[x_spec, w_spec, b_spec, o_spec],
            out_specs=o_spec,
            compiler_params=cparams,
            cost_estimate=cost,
        )(x2d, w2d, bias2, residual)

    if Mp != M:
        out = out[:M]
    return out


# ---------------------------------------------------------------------------
# 3x3 conv + BN + ReLU, no HBM im2col (in-kernel 9-tap accumulation)
# ---------------------------------------------------------------------------
def conv3x3_bn_relu(x_nhwc, w_oihw, bn, stride):
    """y = relu(bn(conv3x3_pad1_stride(x))) as a single Pallas kernel per (batch, N-tile).

    Returns shape (N, Ho*Wo, Cout) bf16 (flattened spatial -> rows for the next 1x1).
    """
    assert stride in (1, 2)
    N, H, W, C = x_nhwc.shape
    Cout = w_oihw.shape[0]
    Ho = (H + 2 - 3) // stride + 1
    Wo = (W + 2 - 3) // stride + 1

    wf, b = fold_bn_into_conv(w_oihw, bn)
    w2d = wf.transpose(2, 3, 1, 0).reshape(9 * C, Cout).astype(jnp.bfloat16)
    bias = b.reshape(1, Cout).astype(jnp.float32)

    xp = jnp.pad(x_nhwc.astype(jnp.bfloat16), ((0, 0), (1, 1), (1, 1), (0, 0)))
    if stride == 1:
        n_ph = 1
        xph = xp                                         # (N, H+2, W+2, C)
    else:
        # One-time polyphase decomposition so every in-kernel tap slice is contiguous.
        n_ph = stride * stride
        phases = [xp[:, ph::stride, pw::stride, :]
                  for ph in range(stride) for pw in range(stride)]
        phases = jnp.stack(phases, axis=1)               # (N, 4, Ho+1, Wo+1, C)
        xph = phases.reshape(N * n_ph, phases.shape[2], phases.shape[3], C)
    Hp2, Wp2 = xph.shape[1], xph.shape[2]

    tn = min(256, Cout)
    assert Cout % tn == 0
    grid = (N, Cout // tn)

    kernel = functools.partial(_conv3x3_bn_relu_kernel,
                               Ho=Ho, Wo=Wo, stride=stride, C=C)
    cost = pl.CostEstimate(
        flops=2 * N * Ho * Wo * 9 * C * Cout, transcendentals=0,
        bytes_accessed=xph.size * 2 + w2d.size * 2 + bias.size * 4
                       + N * Ho * Wo * Cout * 2)

    out = pl.pallas_call(
        kernel,
        out_shape=jax.ShapeDtypeStruct((N, Ho * Wo, Cout), jnp.bfloat16),
        grid=grid,
        in_specs=[
            pl.BlockSpec((n_ph, Hp2, Wp2, C), lambda bidx, j: (bidx, 0, 0, 0)),
            pl.BlockSpec((9 * C, tn), lambda bidx, j: (0, j)),
            pl.BlockSpec((1, tn), lambda bidx, j: (0, j)),
        ],
        out_specs=pl.BlockSpec((1, Ho * Wo, tn), lambda bidx, j: (bidx, 0, j)),
        compiler_params=pltpu.CompilerParams(
            dimension_semantics=("parallel", "parallel"),
            vmem_limit_bytes=VMEM_LIMIT),
        cost_estimate=cost,
    )(xph, w2d, bias)
    return out, Ho, Wo


# ---------------------------------------------------------------------------
# Glue: BN folding, stem im2col, maxpool
# ---------------------------------------------------------------------------
def fold_bn_into_conv(w_oihw, bn, eps=BN_EPS):
    """Fold eval-mode BN into the conv weight (output-channel scale) + bias."""
    s = bn["g"] / jnp.sqrt(bn["v"] + eps)
    b = bn["b"] - bn["m"] * s
    return w_oihw * s[:, None, None, None], b


def im2col(x_nhwc, ksize, stride, pad):
    # TODO(synk): only used for the 7x7 stem conv (3->8 padded channels); absolute
    # traffic is small there.  3x3 convs use the in-kernel 9-tap path above.
    N, H, W, C = x_nhwc.shape
    Ho = (H + 2 * pad - ksize) // stride + 1
    Wo = (W + 2 * pad - ksize) // stride + 1
    xp = jnp.pad(x_nhwc, ((0, 0), (pad, pad), (pad, pad), (0, 0)))
    cols = []
    for kh in range(ksize):
        for kw in range(ksize):
            cols.append(xp[:, kh:kh + stride * (Ho - 1) + 1:stride,
                              kw:kw + stride * (Wo - 1) + 1:stride, :])
    cols = jnp.concatenate(cols, axis=-1)  # (N, Ho, Wo, k*k*C), (kh, kw, ci) ordering
    return cols.reshape(N * Ho * Wo, ksize * ksize * C), Ho, Wo


def maxpool_3x3_s2(x_nhwc):
    # TODO(synk): maxpool is XLA reduce_window glue (not on the matmul hot path).
    return lax.reduce_window(
        x_nhwc, jnp.asarray(-jnp.inf, x_nhwc.dtype), lax.max,
        window_dimensions=(1, 3, 3, 1), window_strides=(1, 2, 2, 1),
        padding=((0, 0), (1, 1), (1, 1), (0, 0)))


# ---------------------------------------------------------------------------
# Pallas-backed forward (NHWC, bf16 activations end-to-end)
# ---------------------------------------------------------------------------
@functools.partial(jax.jit, static_argnames=("stride", "has_downsample"))
def bottleneck_forward(x, p, *, stride, has_downsample):
    N, H, W, Cin = x.shape
    planes = p["w1"].shape[0]

    # conv1 (1x1) + bn1 + relu
    w1, b1 = fold_bn_into_conv(p["w1"], p["bn1"])
    out = fused_matmul_bias_act(x.reshape(N * H * W, Cin), w1[:, :, 0, 0].T, b1)
    out = out.reshape(N, H, W, planes)

    # conv2 (3x3, stride, pad=1) + bn2 + relu  -- in-kernel 9-tap accumulation
    out, Ho, Wo = conv3x3_bn_relu(out, p["w2"], p["bn2"], stride)
    out = out.reshape(N * Ho * Wo, planes)

    # residual branch (identity, or 1x1-stride conv + BN downsample)
    if has_downsample:
        wd, bd = fold_bn_into_conv(p["wd"], p["bnd"])
        x_ds = x[:, ::stride, ::stride, :]
        residual = fused_matmul_bias_act(
            x_ds.reshape(N * Ho * Wo, Cin), wd[:, :, 0, 0].T, bd, apply_relu=False)
    else:
        assert stride == 1 and Cin == planes * EXPANSION
        residual = x.reshape(N * H * W, Cin)

    # conv3 (1x1) + bn3 + residual add + relu  (all fused in one kernel epilogue)
    w3, b3 = fold_bn_into_conv(p["w3"], p["bn3"])
    out = fused_matmul_bias_act(out, w3[:, :, 0, 0].T, b3, residual=residual)
    return out.reshape(N, Ho, Wo, planes * EXPANSION)


@jax.jit
def stem_forward(x, conv1_w, bn1):
    N = x.shape[0]
    # Pad input channels 3 -> 8 so the 7x7 im2col K = 49*8 = 392 is sublane-aligned.
    cpad = 8 - x.shape[-1]
    x8 = jnp.pad(x, ((0, 0), (0, 0), (0, 0), (0, cpad)))
    w8 = jnp.pad(conv1_w, ((0, 0), (0, cpad), (0, 0), (0, 0)))
    w, b = fold_bn_into_conv(w8, bn1)
    cols, Ho, Wo = im2col(x8, 7, 2, 3)
    out = fused_matmul_bias_act(
        cols, w.transpose(2, 3, 1, 0).reshape(-1, w.shape[0]), b)
    out = out.reshape(N, Ho, Wo, w.shape[0])
    return maxpool_3x3_s2(out)


def run_layer(x, layer_params):
    for p, stride, has_ds in layer_params:
        x = bottleneck_forward(x, p, stride=stride, has_downsample=has_ds)
    return x


def b2_resnet_forward(x_nchw, params):
    # Single NHWC transpose at entry; everything stays NHWC/bf16 until the exit transpose.
    x = jnp.transpose(x_nchw, (0, 2, 3, 1)).astype(jnp.bfloat16)
    x = stem_forward(x, params["conv1"], params["bn1"])
    x = run_layer(x, params["layer1"])
    x = run_layer(x, params["layer2"])
    # TODO(synk): on v7x dispatch these two independent branches to separate TensorCores.
    x1 = run_layer(run_layer(x, params["layer3_1"]), params["layer4_1"])
    x2 = run_layer(run_layer(x, params["layer3_2"]), params["layer4_2"])
    to_nchw = lambda t: jnp.transpose(t, (0, 3, 1, 2)).astype(jnp.float32)
    return to_nchw(x1), to_nchw(x2)


# ---------------------------------------------------------------------------
# Reference path (lax.conv based).  Mirrors the kernel path's bf16 rounding points
# (bf16 conv operands, f32 accumulate, bf16 activation storage) so the comparison
# isolates the Pallas lowering from the mixed-precision policy.
# ---------------------------------------------------------------------------
def ref_conv_bn_act(x, w, bn, stride, pad, relu, residual=None):
    wf, b = fold_bn_into_conv(w, bn)
    y = lax.conv_general_dilated(
        x.astype(jnp.bfloat16), wf.astype(jnp.bfloat16),
        window_strides=(stride, stride), padding=[(pad, pad), (pad, pad)],
        dimension_numbers=("NHWC", "OIHW", "NHWC"),
        preferred_element_type=jnp.float32)
    y = y + b[None, None, None, :]
    if residual is not None:
        y = y + residual.astype(jnp.float32)
    if relu:
        y = jnp.maximum(y, 0.0)
    return y.astype(jnp.bfloat16)


@functools.partial(jax.jit, static_argnames=("stride", "has_downsample"))
def ref_bottleneck(x, p, *, stride, has_downsample):
    out = ref_conv_bn_act(x, p["w1"], p["bn1"], 1, 0, True)
    out = ref_conv_bn_act(out, p["w2"], p["bn2"], stride, 1, True)
    if has_downsample:
        residual = ref_conv_bn_act(x, p["wd"], p["bnd"], stride, 0, False)
    else:
        residual = x
    return ref_conv_bn_act(out, p["w3"], p["bn3"], 1, 0, True, residual=residual)


@jax.jit
def ref_stem(x, conv1_w, bn1):
    return maxpool_3x3_s2(ref_conv_bn_act(x, conv1_w, bn1, 2, 3, True))


def ref_run_layer(x, layer_params):
    for p, stride, has_ds in layer_params:
        x = ref_bottleneck(x, p, stride=stride, has_downsample=has_ds)
    return x


def ref_b2_resnet(x_nchw, params):
    x = jnp.transpose(x_nchw, (0, 2, 3, 1)).astype(jnp.bfloat16)
    x = ref_stem(x, params["conv1"], params["bn1"])
    x = ref_run_layer(x, params["layer1"])
    x = ref_run_layer(x, params["layer2"])
    x1 = ref_run_layer(ref_run_layer(x, params["layer3_1"]), params["layer4_1"])
    x2 = ref_run_layer(ref_run_layer(x, params["layer3_2"]), params["layer4_2"])
    to_nchw = lambda t: jnp.transpose(t, (0, 3, 1, 2)).astype(jnp.float32)
    return to_nchw(x1), to_nchw(x2)


# ---------------------------------------------------------------------------
# Deterministic parameter construction (mirrors the PyTorch module structure)
# ---------------------------------------------------------------------------
def make_conv_weight(key, cout, cin, k):
    std = (2.0 / (k * k * cout)) ** 0.5  # matches the module's normal_(0, sqrt(2/n)) init
    return std * jax.random.normal(key, (cout, cin, k, k), jnp.float32)


def make_bn_params(key, c):
    k1, k2, k3, k4 = jax.random.split(key, 4)
    return {
        "g": 1.0 + 0.1 * jax.random.normal(k1, (c,), jnp.float32),
        "b": 0.1 * jax.random.normal(k2, (c,), jnp.float32),
        "m": 0.1 * jax.random.normal(k3, (c,), jnp.float32),
        "v": 1.0 + 0.1 * jnp.abs(jax.random.normal(k4, (c,), jnp.float32)),
    }


def make_bottleneck_params(key, inplanes, planes, has_downsample):
    ks = jax.random.split(key, 8)
    p = {
        "w1": make_conv_weight(ks[0], planes, inplanes, 1),
        "bn1": make_bn_params(ks[1], planes),
        "w2": make_conv_weight(ks[2], planes, planes, 3),
        "bn2": make_bn_params(ks[3], planes),
        "w3": make_conv_weight(ks[4], planes * EXPANSION, planes, 1),
        "bn3": make_bn_params(ks[5], planes * EXPANSION),
    }
    if has_downsample:
        p["wd"] = make_conv_weight(ks[6], planes * EXPANSION, inplanes, 1)
        p["bnd"] = make_bn_params(ks[7], planes * EXPANSION)
    return p


def make_layer_params(key, inplanes, planes, blocks, stride):
    ks = jax.random.split(key, blocks)
    has_ds = (stride != 1) or (inplanes != planes * EXPANSION)
    layer = [(make_bottleneck_params(ks[0], inplanes, planes, has_ds), stride, has_ds)]
    inplanes = planes * EXPANSION
    for i in range(1, blocks):
        layer.append((make_bottleneck_params(ks[i], inplanes, planes, False), 1, False))
    return layer, inplanes


def make_b2_resnet_params(key):
    ks = jax.random.split(key, 8)
    params = {"conv1": make_conv_weight(ks[0], 64, 3, 7),
              "bn1": make_bn_params(ks[1], 64)}
    inplanes = 64
    params["layer1"], inplanes = make_layer_params(ks[2], inplanes, 64, 3, 1)
    params["layer2"], inplanes = make_layer_params(ks[3], inplanes, 128, 4, 2)
    params["layer3_1"], inplanes = make_layer_params(ks[4], inplanes, 256, 6, 2)
    params["layer4_1"], inplanes = make_layer_params(ks[5], inplanes, 512, 3, 2)
    inplanes = 512  # second branch restarts from the layer2 trunk width (as in the spec)
    params["layer3_2"], inplanes = make_layer_params(ks[6], inplanes, 256, 6, 2)
    params["layer4_2"], inplanes = make_layer_params(ks[7], inplanes, 512, 3, 2)
    return params


if __name__ == "__main__":
    key = jax.random.PRNGKey(0)
    kx, kp = jax.random.split(key)

    # Small spatial size; channel widths (3 -> 64 -> ... -> 2048) are fixed by the module.
    batch, spatial = 2, 64
    x = jax.random.normal(kx, (batch, 3, spatial, spatial), jnp.float32)
    params = make_b2_resnet_params(kp)

    x1, x2 = b2_resnet_forward(x, params)
    x1 = jax.block_until_ready(x1)
    x2 = jax.block_until_ready(x2)

    r1, r2 = ref_b2_resnet(x, params)
    r1 = jax.block_until_ready(r1)
    r2 = jax.block_until_ready(r2)

    out_spatial = spatial // 32
    assert x1.shape == r1.shape == (batch, 2048, out_spatial, out_spatial)
    assert x2.shape == r2.shape == (batch, 2048, out_spatial, out_spatial)

    def rel_err(a, b):
        return float(jnp.max(jnp.abs(a - b)) / (jnp.max(jnp.abs(b)) + 1e-6))

    e1, e2 = rel_err(x1, r1), rel_err(x2, r2)
    assert e1 < 5e-2 and e2 < 5e-2, f"mismatch vs reference: {e1:.4f}, {e2:.4f}"
    print("KERNEL_OK")
</pallas_src>

<mosaic_0001>
module attributes {stable_mosaic.version = 11 : i64} {
  func.func @_matmul_bias_act_kernel(%arg0: i32, %arg1: i32, %arg2: memref<512x392xbf16, #tpu.memory_space<vmem>>, %arg3: memref<392x64xbf16, #tpu.memory_space<vmem>>, %arg4: memref<1x64xf32, #tpu.memory_space<vmem>>, %arg5: memref<512x64xbf16, #tpu.memory_space<vmem>>) attributes {dimension_semantics = [#tpu.dimension_semantics<parallel>, #tpu.dimension_semantics<parallel>], iteration_bounds = array<i64: 4, 1>, scalar_prefetch = 0 : i64, scratch_operands = 0 : i64, tpu.core_type = #tpu.core_type<tc>, window_params = [{transform_indices = @transform_0, window_bounds = array<i64: 512, 392>}, {transform_indices = @transform_1, window_bounds = array<i64: 392, 64>}, {transform_indices = @transform_2, window_bounds = array<i64: 1, 64>}, {transform_indices = @transform_3, window_bounds = array<i64: 512, 64>}]} {
    %c0 = arith.constant 0 : index
    %c0_0 = arith.constant 0 : index
    %0 = vector.load %arg2[%c0, %c0_0] : memref<512x392xbf16, #tpu.memory_space<vmem>>, vector<512x392xbf16>
    %c0_1 = arith.constant 0 : index
    %c0_2 = arith.constant 0 : index
    %1 = vector.load %arg3[%c0_1, %c0_2] : memref<392x64xbf16, #tpu.memory_space<vmem>>, vector<392x64xbf16>
    %cst = arith.constant dense<0.000000e+00> : vector<512x64xf32>
    %2 = tpu.matmul %0, %1, %cst {dimension_numbers = #tpu.dot_dimension_numbers<[1], [0], [0], [1], [0, 0, 1, 1], [], []>} : vector<512x392xbf16>, vector<392x64xbf16>, vector<512x64xf32> -> vector<512x64xf32>
    %c0_3 = arith.constant 0 : index
    %c0_4 = arith.constant 0 : index
    %3 = vector.load %arg4[%c0_3, %c0_4] : memref<1x64xf32, #tpu.memory_space<vmem>>, vector<1x64xf32>
    %4 = vector.broadcast %3 : vector<1x64xf32> to vector<512x64xf32>
    %5 = arith.addf %2, %4 : vector<512x64xf32>
    %cst_5 = arith.constant 0.000000e+00 : f32
    %6 = vector.broadcast %cst_5 : f32 to vector<512x64xf32>
    %7 = arith.maximumf %5, %6 : vector<512x64xf32>
    %8 = arith.truncf %7 : vector<512x64xf32> to vector<512x64xbf16>
    %c0_6 = arith.constant 0 : index
    %c0_7 = arith.constant 0 : index
    %9 = vector.load %arg5[%c0_6, %c0_7] : memref<512x64xbf16, #tpu.memory_space<vmem>>, vector<512x64xbf16>
    tpu.vector_store %arg5[%c0_6, %c0_7], %8 {strides = array<i32>} : memref<512x64xbf16, #tpu.memory_space<vmem>>, vector<512x64xbf16>,
    return
  }
  func.func @transform_0(%arg0: i32, %arg1: i32) -> (i32, i32) {
    %c0_i32 = arith.constant 0 : i32
    %c0_i32_0 = arith.constant 0 : i32
    return %arg0, %c0_i32 : i32, i32
  }
  func.func @transform_1(%arg0: i32, %arg1: i32) -> (i32, i32) {
    %c0_i32 = arith.constant 0 : i32
    %c0_i32_0 = arith.constant 0 : i32
    return %c0_i32, %arg1 : i32, i32
  }
  func.func @transform_2(%arg0: i32, %arg1: i32) -> (i32, i32) {
    %c0_i32 = arith.constant 0 : i32
    %c0_i32_0 = arith.constant 0 : i32
    return %c0_i32, %arg1 : i32, i32
  }
  func.func @transform_3(%arg0: i32, %arg1: i32) -> (i32, i32) {
    %c0_i32 = arith.constant 0 : i32
    return %arg0, %arg1 : i32, i32
  }
}

</mosaic_0001>

<bundles_post_ra>
// kernel: stem_forward.1
= control target key start
LH: loop header
LB: loop body
LE: loop exit
PB: predicated region body
PF: predicated region fallthrough
CT: control target
= control target key end

     0   :  { %s3079_s12 = smov 0   ;;  %s3081_s13 = smov 0   ;;  %s3603_s0 = inlined_call_operand.vmem [shape: bf16[2048,392], index: 0, kind: input, shape index: {}]   ;;  %s3604_s1 = inlined_call_operand.vmem [shape: bf16[392,64], index: 1, kind: input, shape index: {}]   ;;  %s3605_s2 = inlined_call_operand.vmem [shape: f32[1,64], index: 2, kind: input, shape index: {}]   ;;  %s3606_s3 = inlined_call_operand.vmem [shape: bf16[2048,64], index: 3, kind: output, shape index: {}]  }
   0x1   :  { %s3083_s14 = smov 0  }
   0x2 LB: > { %s25_s15 = sadd.s32 1, %s3052_s13  ;;  %p2340_p0 = scmp.ge.s32.totalorder %s3056_s14, 1  ;;  %s3056_s14 = sphi %s3083_s14, %s13_s14   ;;  %s3052_s13 = sphi %s3081_s13, %s3608_s13   ;;  %s3048_s12 = sphi %s3079_s12, %s3607_s12  }
   0x3   : > { %p27_p1 = scmp.ge.s32.totalorder %s25_s15, 4  ;;  %p170_p2 = scmp.lt.s32.totalorder %s3056_s14, 5 }
   0x5   : > { %s3610_s15 = smov (%p27_p1, %s25_s15), 0  ;;  %p171_p3 = pnand %p2340_p0, %p170_p2 }
   0x6   : > { %v2816_v0 = vld [vmem:[%s3604_s1] sm:$0xff] (!%p171_p3)   ;;  %v3058_v1 = vmov (!%p171_p3), 0   ;;  %v2817_v2 = vld [vmem:[%s3604_s1 + $0x8] sm:$0xff] (!%p171_p3)   ;;  %v2818_v3 = vld [vmem:[%s3604_s1 + $0x10] sm:$0xff] (!%p171_p3)   ;;  %s2341_s24 = sshll.u32 (!%p171_p3), %s3048_s12, 6  ;;  %vm1168_vm0 = vcmask (!%p171_p3), 64512  }
   0x7   : > { %174 = sbr.rel (%p171_p3) target bundleno = 542 (0x21e), region = 32  ;;  %1269 = vmatprep.subr.bf16.mxu1 (!%p171_p3), %v3058_v1  ;;  %1558 = vmatprep.subr.bf16.mxu0 (!%p171_p3), %v3058_v1  ;;  %v2823_v4 = vld [vmem:[%s3604_s1 + $0x80] sm:$0xff] (!%p171_p3)   ;;  %v2825_v5 = vld [vmem:[%s3604_s1 + $0x88] sm:$0xff] (!%p171_p3)   ;;  %v2819_v6 = vld [vmem:[%s3604_s1 + $0x18] sm:$0xff] (!%p171_p3)   ;;  %p206_p4 = scmp.lt.s32.totalorder (!%p171_p3), %s2341_s24, 255  ;;  %vm1265_vm1 = vcmask (!%p171_p3), 1043456  }
   0x8   : > { %1270 = vmatpush1.bf16.msra.mxu1 (!%p171_p3), %v2816_v0  ;;  %1559 = vmatpush1.bf16.msra.mxu0 (!%p171_p3), %v2823_v4  ;;  %v2827_v7 = vld [vmem:[%s3604_s1 + $0x90] sm:$0xff] (!%p171_p3)   ;;  %v2820_v8 = vld [vmem:[%s3604_s1 + $0x20] sm:$0xff] (!%p171_p3)   ;;  %v2829_v9 = vld [vmem:[%s3604_s1 + $0x98] sm:$0xff] (!%p171_p3)   ;;  %vm2167_vm2 = vcmask (!%p171_p3), 519168  }
   0x9   : > { %1271 = vmatprep.subr.bf16.mxu1 (!%p171_p3), %v3058_v1  ;;  %1560 = vmatprep.subr.bf16.mxu0 (!%p171_p3), %v3058_v1  ;;  %v2821_v10 = vld [vmem:[%s3604_s1 + $0x28] sm:$0xff] (!%p171_p3)   ;;  %v2831_v11 = vld [vmem:[%s3604_s1 + $0xa0] sm:$0xff] (!%p171_p3)   ;;  %v2822_v12 = vld [vmem:[%s3604_s1 + $0x30] sm:$0xff] (!%p171_p3)  }
   0xa   : > { %v2833_v13 = vld [vmem:[%s3604_s1 + $0xa8] sm:$0xff] (!%p171_p3)   ;;  %v2824_v15 = vld [vmem:[%s3604_s1 + $0x38] sm:$0xff] (!%p171_p3)   ;;  %v2835_v17 = vld [vmem:[%s3604_s1 + $0xb0] sm:$0xff] (!%p171_p3)  }
   0xb   : > { %v2826_v18 = vld [vmem:[%s3604_s1 + $0x40] sm:$0xff] (!%p171_p3)   ;;  %v2837_v19 = vld [vmem:[%s3604_s1 + $0xb8] sm:$0xff] (!%p171_p3)   ;;  %v2828_v20 = vld [vmem:[%s3604_s1 + $0x48] sm:$0xff] (!%p171_p3)  }
   0xc   : > { %1272 = vmatpush1.bf16.msra.mxu1 (!%p171_p3), %v2817_v2  ;;  %1561 = vmatpush1.bf16.msra.mxu0 (!%p171_p3), %v2825_v5  ;;  %v2839_v21 = vld [vmem:[%s3604_s1 + $0xc0] ss:$0 sps:$4 sm:$0xff] (!%p171_p3)   ;;  %v2830_v22 = vld [vmem:[%s3604_s1 + $0x50] sm:$0xff] (!%p171_p3)   ;;  %v2832_v26 = vld [vmem:[%s3604_s1 + $0x58] sm:$0xff] (!%p171_p3)  }
   0xd   : > { %1273 = vmatprep.subr.bf16.mxu1 (!%p171_p3), %v3058_v1  ;;  %1562 = vmatprep.subr.bf16.mxu0 (!%p171_p3), %v3058_v1  ;;  %v1267_v23 = vsel (!%p171_p3), %vm1265_vm1, %v2839_v21, 0  ;;  %v2834_v27 = vld [vmem:[%s3604_s1 + $0x60] sm:$0xff] (!%p171_p3)   ;;  %v2836_v30 = vld [vmem:[%s3604_s1 + $0x68] sm:$0xff] (!%p171_p3)   ;;  %v2838_v31 = vld [vmem:[%s3604_s1 + $0x70] sm:$0xff] (!%p171_p3)  }
   0xe   : > { %s3612_s24 = smov (!%p206_p4, %s2341_s24), 255  ;;  %v2840_v34 = vld [vmem:[%s3604_s1 + $0x78] sm:$0xff]  }
   0xf   : > { %s2598_s10 = sshll.u32 %s3612_s24, 4  ;;  %s2345_s28 = sshll.u32 %s3612_s24, 2 }
  0x10   : > { %1274 = vmatpush1.bf16.msra.mxu1 %v2818_v3  ;;  %1563 = vmatpush1.bf16.msra.mxu0 %v2827_v7  ;;  %s3153_s20 = scalar_lea.vmem %s3603_s0, %s2598_s10  ;;  %s3378_s24 = scalar_lea.vmem %s3606_s3, %s2345_s28 }
  0x11   : > { %1275 = vmatprep.subr.bf16.mxu1 %v3058_v1  ;;  %1564 = vmatprep.subr.bf16.mxu0 %v3058_v1  ;;  %v2843_v14 = vld [vmem:[%s3153_s20 + $0xc] ss:$16 sps:$4 sm:$0xff]   ;;  %v2846_v16 = vld [vmem:[%s3153_s20 + $0x4] ss:$16 sps:$4 sm:$0xff]   ;;  %v2841_v24 = vld [vmem:[%s3153_s20 + $0x8] ss:$16 sps:$4 sm:$0xff]  }
  0x12   : > { %2500 = vmatprep.mubr.msk.bf16.mxu0 %vm1168_vm0, %v2843_v14  ;;  %1301 = vmatprep.mubr.bf16.mxu1 %v2846_v16  ;;  %v2847_v25 = vld [vmem:[%s3153_s20 + $0x2c] ss:$16 sps:$4 sm:$0xff]   ;;  %v2851_v28 = vld [vmem:[%s3153_s20 + $0x28] ss:$16 sps:$4 sm:$0xff]   ;;  %v2844_v35 = vld [vmem:[%s3153_s20] ss:$16 sps:$4 sm:$0xff]  }
  0x13   : > { %v2853_v29 = vld [vmem:[%s3153_s20 + $0x4c] ss:$16 sps:$4 sm:$0xff]   ;;  %v2857_v32 = vld [vmem:[%s3153_s20 + $0x48] ss:$16 sps:$4 sm:$0xff]   ;;  %v2849_v36 = vld [vmem:[%s3153_s20 + $0x24] ss:$16 sps:$4 sm:$0xff]  }
  0x14   : > { %1276 = vmatpush1.bf16.msra.mxu1 %v2819_v6  ;;  %1565 = vmatpush1.bf16.msra.mxu0 %v2829_v9  ;;  %v2859_v33 = vld [vmem:[%s3153_s20 + $0x6c] ss:$16 sps:$4 sm:$0xff]   ;;  %v2863_v37 = vld [vmem:[%s3153_s20 + $0x68] ss:$16 sps:$4 sm:$0xff]   ;;  %v2852_v39 = vld [vmem:[%s3153_s20 + $0x20] ss:$16 sps:$4 sm:$0xff]  }
  0x15   : > { %1277 = vmatprep.subr.bf16.mxu1 %v3058_v1  ;;  %1566 = vmatprep.subr.bf16.mxu0 %v3058_v1  ;;  %v2865_v38 = vld [vmem:[%s3153_s20 + $0x8c] ss:$16 sps:$4 sm:$0xff]   ;;  %v2855_v40 = vld [vmem:[%s3153_s20 + $0x44] ss:$16 sps:$4 sm:$0xff]   ;;  %v2869_v41 = vld [vmem:[%s3153_s20 + $0x88] ss:$16 sps:$4 sm:$0xff]  }
  0x16   : > { %v2871_v42 = vld [vmem:[%s3153_s20 + $0xac] ss:$16 sps:$4 sm:$0xff]   ;;  %v2858_v43 = vld [vmem:[%s3153_s20 + $0x40] ss:$16 sps:$4 sm:$0xff]   ;;  %v2861_v44 = vld [vmem:[%s3153_s20 + $0x64] ss:$16 sps:$4 sm:$0xff]  }
  0x17   : > { %v2875_v45 = vld [vmem:[%s3153_s20 + $0xa8] ss:$16 sps:$4 sm:$0xff]   ;;  %v2877_v46 = vld [vmem:[%s3153_s20 + $0xcc] ss:$16 sps:$4 sm:$0xff]   ;;  %v2864_v47 = vld [vmem:[%s3153_s20 + $0x60] ss:$16 sps:$4 sm:$0xff]  }
  0x18   : > { %1278 = vmatpush1.bf16.msra.mxu1 %v2820_v8  ;;  %1567 = vmatpush1.bf16.msra.mxu0 %v2831_v11  ;;  %v2867_v48 = vld [vmem:[%s3153_s20 + $0x84] ss:$16 sps:$4 sm:$0xff]   ;;  %v2881_v49 = vld [vmem:[%s3153_s20 + $0xc8] ss:$16 sps:$4 sm:$0xff]   ;;  %v2883_v50 = vld [vmem:[%s3153_s20 + $0xec] ss:$16 sps:$4 sm:$0xff]  }
  0x19   : > { %1279 = vmatprep.subr.bf16.mxu1 %v3058_v1  ;;  %1568 = vmatprep.subr.bf16.mxu0 %v3058_v1  ;;  %v2870_v51 = vld [vmem:[%s3153_s20 + $0x80] ss:$16 sps:$4 sm:$0xff]   ;;  %v2873_v52 = vld [vmem:[%s3153_s20 + $0xa4] ss:$16 sps:$4 sm:$0xff]   ;;  %v2887_v53 = vld [vmem:[%s3153_s20 + $0xe8] ss:$16 sps:$4 sm:$0xff]  }
  0x1a   : > { %v2889_v54 = vld [vmem:[%s3153_s20 + $0x10c] ss:$16 sps:$4 sm:$0xff]   ;;  %v2876_v55 = vld [vmem:[%s3153_s20 + $0xa0] ss:$16 sps:$4 sm:$0xff]   ;;  %v2879_v56 = vld [vmem:[%s3153_s20 + $0xc4] ss:$16 sps:$4 sm:$0xff]  }
  0x1b   : > { %v2893_v57 = vld [vmem:[%s3153_s20 + $0x108] ss:$16 sps:$4 sm:$0xff]   ;;  %v2895_v58 = vld [vmem:[%s3153_s20 + $0x12c] ss:$16 sps:$4 sm:$0xff]   ;;  %v2882_v59 = vld [vmem:[%s3153_s20 + $0xc0] ss:$16 sps:$4 sm:$0xff]  }
  0x1c   : > { %1280 = vmatpush1.bf16.msra.mxu1 %v2821_v10  ;;  %1569 = vmatpush1.bf16.msra.mxu0 %v2833_v13  ;;  %v2885_v60 = vld [vmem:[%s3153_s20 + $0xe4] ss:$16 sps:$4 sm:$0xff]   ;;  %v2899_v61 = vld [vmem:[%s3153_s20 + $0x128] ss:$16 sps:$4 sm:$0xff]   ;;  %v2901_v62 = vld [vmem:[%s3153_s20 + $0x14c] ss:$16 sps:$4 sm:$0xff]  }
  0x1d   : > { %1281 = vmatprep.subr.bf16.mxu1 %v3058_v1  ;;  %1570 = vmatprep.subr.bf16.mxu0 %v3058_v1  ;;  %v2888_v63 = vld [vmem:[%s3153_s20 + $0xe0] ss:$16 sps:$4 sm:$0xff]   ;;  %v2891_v0 = vld [vmem:[%s3153_s20 + $0x104] ss:$16 sps:$4 sm:$0xff]   ;;  %v2907_v2 = vld [vmem:[%s3153_s20 + $0x16c] ss:$16 sps:$4 sm:$0xff]  }
  0x1e   : > { %v2894_v3 = vld [vmem:[%s3153_s20 + $0x100] ss:$16 sps:$4 sm:$0xff]   ;;  %v2897_v4 = vld [vmem:[%s3153_s20 + $0x124] ss:$16 sps:$4 sm:$0xff]   ;;  %v2911_v5 = vld [vmem:[%s3153_s20 + $0x168] ss:$16 sps:$4 sm:$0xff]  }
  0x1f   : > { %v2913_v6 = vld [vmem:[%s3153_s20 + $0x18c] ss:$16 sps:$4 sm:$0xff]   ;;  %v2900_v7 = vld [vmem:[%s3153_s20 + $0x120] ss:$16 sps:$4 sm:$0xff]   ;;  %v2903_v8 = vld [vmem:[%s3153_s20 + $0x144] ss:$16 sps:$4 sm:$0xff]  }
  0x20   : > { %1282 = vmatpush1.bf16.msra.mxu1 %v2822_v12  ;;  %1571 = vmatpush1.bf16.msra.mxu0 %v2835_v17  ;;  %v2917_v9 = vld [vmem:[%s3153_s20 + $0x188] ss:$16 sps:$4 sm:$0xff]   ;;  %v2919_v10 = vld [vmem:[%s3153_s20 + $0x1ac] ss:$16 sps:$4 sm:$0xff]   ;;  %v2906_v11 = vld [vmem:[%s3153_s20 + $0x140] ss:$16 sps:$4 sm:$0xff]  }
  0x21   : > { %1283 = vmatprep.subr.bf16.mxu1 %v3058_v1  ;;  %1572 = vmatprep.subr.bf16.mxu0 %v3058_v1  ;;  %v2909_v12 = vld [vmem:[%s3153_s20 + $0x164] ss:$16 sps:$4 sm:$0xff]   ;;  %v2923_v13 = vld [vmem:[%s3153_s20 + $0x1a8] ss:$16 sps:$4 sm:$0xff]   ;;  %v2925_v14 = vld [vmem:[%s3153_s20 + $0x1cc] ss:$16 sps:$4 sm:$0xff]  }
  0x22   : > { %v2915_v16 = vld [vmem:[%s3153_s20 + $0x184] ss:$16 sps:$4 sm:$0xff]   ;;  %v2929_v17 = vld [vmem:[%s3153_s20 + $0x1c8] ss:$16 sps:$4 sm:$0xff]  }
  0x23   : > { %v2935_v21 = vld [vmem:[%s3153_s20 + $0x1e8] ss:$16 sps:$4 sm:$0xff]  }
  0x24   : > { %1284 = vmatpush1.bf16.msra.mxu1 %v2824_v15  ;;  %1573 = vmatpush1.bf16.msra.mxu0 %v2837_v19  ;;  %v2912_v15 = vld [vmem:[%s3153_s20 + $0x160] ss:$16 sps:$4 sm:$0xff]  }
  0x25   : > { %1285 = vmatprep.subr.bf16.mxu1 %v3058_v1  ;;  %1574 = vmatprep.subr.bf16.mxu0 %v3058_v1  ;;  %v2918_v19 = vld [vmem:[%s3153_s20 + $0x180] ss:$16 sps:$4 sm:$0xff]  }
  0x28   : > { %1286 = vmatpush1.bf16.msra.mxu1 %v2826_v18  ;;  %1575 = vmatpush1.bf16.msra.mxu0 %v1267_v23  ;;  %v2931_v18 = vld [vmem:[%s3153_s20 + $0x1ec] ss:$16 sps:$4 sm:$0xff]   ;;  %v2924_v23 = vld [vmem:[%s3153_s20 + $0x1a0] ss:$16 sps:$4 sm:$0xff]  }
  0x29   : > { %1287 = vmatprep.subr.bf16.mxu1 %v3058_v1 }
  0x2b   : > { %1591 = vmatmul.mubr.bf16.vlgmr.msra.gmra.mrb[0].mxu0 %v2841_v24  ;;  %v2927_v24 = vld [vmem:[%s3153_s20 + $0x1c4] ss:$16 sps:$4 sm:$0xff]  }
  0x2c   : > { %1288 = vmatpush1.bf16.msra.mxu1 %v2828_v20  ;;  %2501 = vmatprep.mubr.msk.bf16.mxu0 %vm1168_vm0, %v2847_v25  ;;  %v2921_v20 = vld [vmem:[%s3153_s20 + $0x1a4] ss:$16 sps:$4 sm:$0xff]   ;;  %v2941_v25 = vld [vmem:[%s3153_s20 + $0x208] ss:$16 sps:$4 sm:$0xff]  }
  0x2d   : > { %1289 = vmatprep.subr.bf16.mxu1 %v3058_v1 }
  0x30   : > { %1290 = vmatpush1.bf16.msra.mxu1 %v2830_v22  ;;  %v2937_v22 = vld [vmem:[%s3153_s20 + $0x20c] ss:$16 sps:$4 sm:$0xff]  }
  0x31   : > { %1291 = vmatprep.subr.bf16.mxu1 %v3058_v1 }
  0x33   : > { %1599 = vmatmul.mubr.bf16.gmra.mrb[4].mxu0 %v2851_v28  ;;  %v2933_v28 = vld [vmem:[%s3153_s20 + $0x1e4] ss:$16 sps:$4 sm:$0xff]  }
  0x34   : > { %1292 = vmatpush1.bf16.msra.mxu1 %v2832_v26  ;;  %2502 = vmatprep.mubr.msk.bf16.mxu0 %vm1168_vm0, %v2853_v29  ;;  %v2943_v26 = vld [vmem:[%s3153_s20 + $0x22c] ss:$16 sps:$4 sm:$0xff]   ;;  %v2947_v29 = vld [vmem:[%s3153_s20 + $0x228] ss:$16 sps:$4 sm:$0xff]  }
  0x35   : > { %1293 = vmatprep.subr.bf16.mxu1 %v3058_v1 }
  0x38   : > { %1294 = vmatpush1.bf16.msra.mxu1 %v2834_v27  ;;  %v2930_v27 = vld [vmem:[%s3153_s20 + $0x1c0] ss:$16 sps:$4 sm:$0xff]  }
  0x39   : > { %1295 = vmatprep.subr.bf16.mxu1 %v3058_v1 }
  0x3b   : > { %1607 = vmatmul.mubr.bf16.gmra.mrb[8].mxu0 %v2857_v32  ;;  %v2939_v32 = vld [vmem:[%s3153_s20 + $0x204] ss:$16 sps:$4 sm:$0xff]  }
  0x3c   : > { %1296 = vmatpush1.bf16.msra.mxu1 %v2836_v30  ;;  %2503 = vmatprep.mubr.msk.bf16.mxu0 %vm1168_vm0, %v2859_v33  ;;  %v2949_v30 = vld [vmem:[%s3153_s20 + $0x24c] ss:$16 sps:$4 sm:$0xff]   ;;  %v2953_v33 = vld [vmem:[%s3153_s20 + $0x248] ss:$16 sps:$4 sm:$0xff]  }
  0x3d   : > { %1297 = vmatprep.subr.bf16.mxu1 %v3058_v1 }
  0x40   : > { %1298 = vmatpush1.bf16.msra.mxu1 %v2838_v31  ;;  %v2936_v31 = vld [vmem:[%s3153_s20 + $0x1e0] ss:$16 sps:$4 sm:$0xff]  }
  0x41   : > { %1299 = vmatprep.subr.bf16.mxu1 %v3058_v1  ;;  %v2905_v1 = vld [vmem:[%s3153_s20 + $0x148] ss:$16 sps:$4 sm:$0xff]  }
  0x43   : > { %1615 = vmatmul.mubr.bf16.gmra.mrb[12].mxu0 %v2863_v37  ;;  %v2959_v37 = vld [vmem:[%s3153_s20 + $0x268] ss:$16 sps:$4 sm:$0xff]  }
  0x44   : > { %1300 = vmatpush1.bf16.msra.mxu1 %v2840_v34  ;;  %2504 = vmatprep.mubr.msk.bf16.mxu0 %vm1168_vm0, %v2865_v38  ;;  %v2955_v34 = vld [vmem:[%s3153_s20 + $0x26c] ss:$16 sps:$4 sm:$0xff]  }
  0x45   : > { %v2961_v38 = vld [vmem:[%s3153_s20 + $0x28c] ss:$16 sps:$4 sm:$0xff]  }
  0x47   : > { %1302 = vmatmul.mubr.bf16.vlgmr.msra.gmra.mrb[0].mxu1 %v2844_v35  ;;  %v2942_v35 = vld [vmem:[%s3153_s20 + $0x200] ss:$16 sps:$4 sm:$0xff]  }
  0x48   : > { %1309 = vmatprep.mubr.bf16.mxu1 %v2849_v36  ;;  %v2945_v36 = vld [vmem:[%s3153_s20 + $0x224] ss:$16 sps:$4 sm:$0xff]  }
  0x4b   : > { %1623 = vmatmul.mubr.bf16.gmra.mrb[16].mxu0 %v2869_v41  ;;  %v2965_v41 = vld [vmem:[%s3153_s20 + $0x288] ss:$16 sps:$4 sm:$0xff]  }
  0x4c   : > { %2505 = vmatprep.mubr.msk.bf16.mxu0 %vm1168_vm0, %v2871_v42  ;;  %v2967_v42 = vld [vmem:[%s3153_s20 + $0x2ac] ss:$16 sps:$4 sm:$0xff]  }
  0x4f   : > { %1310 = vmatmul.mubr.bf16.gmra.mrb[4].mxu1 %v2852_v39  ;;  %v2948_v39 = vld [vmem:[%s3153_s20 + $0x220] ss:$16 sps:$4 sm:$0xff]  }
  0x50   : > { %1317 = vmatprep.mubr.bf16.mxu1 %v2855_v40  ;;  %v2951_v40 = vld [vmem:[%s3153_s20 + $0x244] ss:$16 sps:$4 sm:$0xff]  }
  0x53   : > { %1631 = vmatmul.mubr.bf16.gmra.mrb[20].mxu0 %v2875_v45  ;;  %v2971_v45 = vld [vmem:[%s3153_s20 + $0x2a8] ss:$16 sps:$4 sm:$0xff]  }
  0x54   : > { %2506 = vmatprep.mubr.msk.bf16.mxu0 %vm1168_vm0, %v2877_v46  ;;  %v2973_v46 = vld [vmem:[%s3153_s20 + $0x2cc] ss:$16 sps:$4 sm:$0xff]  }
  0x57   : > { %1318 = vmatmul.mubr.bf16.gmra.mrb[8].mxu1 %v2858_v43  ;;  %v2954_v43 = vld [vmem:[%s3153_s20 + $0x240] ss:$16 sps:$4 sm:$0xff]  }
  0x58   : > { %1325 = vmatprep.mubr.bf16.mxu1 %v2861_v44  ;;  %v2957_v44 = vld [vmem:[%s3153_s20 + $0x264] ss:$16 sps:$4 sm:$0xff]  }
  0x5b   : > { %1639 = vmatmul.mubr.bf16.gmra.mrb[24].mxu0 %v2881_v49  ;;  %v2977_v49 = vld [vmem:[%s3153_s20 + $0x2c8] ss:$16 sps:$4 sm:$0xff]  }
  0x5c   : > { %2507 = vmatprep.mubr.msk.bf16.mxu0 %vm1168_vm0, %v2883_v50  ;;  %v2979_v50 = vld [vmem:[%s3153_s20 + $0x2ec] ss:$16 sps:$4 sm:$0xff]  }
  0x5f   : > { %1326 = vmatmul.mubr.bf16.gmra.mrb[12].mxu1 %v2864_v47  ;;  %v2960_v47 = vld [vmem:[%s3153_s20 + $0x260] ss:$16 sps:$4 sm:$0xff]  }
  0x60   : > { %1333 = vmatprep.mubr.bf16.mxu1 %v2867_v48  ;;  %v2963_v48 = vld [vmem:[%s3153_s20 + $0x284] ss:$16 sps:$4 sm:$0xff]  }
  0x63   : > { %1647 = vmatmul.mubr.bf16.gmra.mrb[28].mxu0 %v2887_v53  ;;  %v2983_v53 = vld [vmem:[%s3153_s20 + $0x2e8] ss:$16 sps:$4 sm:$0xff]  }
  0x64   : > { %2508 = vmatprep.mubr.msk.bf16.mxu0 %vm1168_vm0, %v2889_v54  ;;  %v2985_v54 = vld [vmem:[%s3153_s20 + $0x30c] ss:$16 sps:$4 sm:$0xff]  }
  0x67   : > { %1334 = vmatmul.mubr.bf16.gmra.mrb[16].mxu1 %v2870_v51  ;;  %v2966_v51 = vld [vmem:[%s3153_s20 + $0x280] ss:$16 sps:$4 sm:$0xff]  }
  0x68   : > { %1341 = vmatprep.mubr.bf16.mxu1 %v2873_v52  ;;  %v2969_v52 = vld [vmem:[%s3153_s20 + $0x2a4] ss:$16 sps:$4 sm:$0xff]  }
  0x6b   : > { %1655 = vmatmul.mubr.bf16.gmra.mrb[32].mxu0 %v2893_v57  ;;  %v2989_v57 = vld [vmem:[%s3153_s20 + $0x308] ss:$16 sps:$4 sm:$0xff]  }
  0x6c   : > { %2509 = vmatprep.mubr.msk.bf16.mxu0 %vm1168_vm0, %v2895_v58  ;;  %v2991_v58 = vld [vmem:[%s3153_s20 + $0x32c] ss:$16 sps:$4 sm:$0xff]  }
  0x6f   : > { %1342 = vmatmul.mubr.bf16.gmra.mrb[20].mxu1 %v2876_v55  ;;  %v2972_v55 = vld [vmem:[%s3153_s20 + $0x2a0] ss:$16 sps:$4 sm:$0xff]  }
  0x70   : > { %1349 = vmatprep.mubr.bf16.mxu1 %v2879_v56  ;;  %v2975_v56 = vld [vmem:[%s3153_s20 + $0x2c4] ss:$16 sps:$4 sm:$0xff]  }
  0x73   : > { %1663 = vmatmul.mubr.bf16.gmra.mrb[36].mxu0 %v2899_v61  ;;  %v2995_v61 = vld [vmem:[%s3153_s20 + $0x328] ss:$16 sps:$4 sm:$0xff]  }
  0x74   : > { %2510 = vmatprep.mubr.msk.bf16.mxu0 %vm1168_vm0, %v2901_v62  ;;  %v2997_v62 = vld [vmem:[%s3153_s20 + $0x34c] ss:$16 sps:$4 sm:$0xff]  }
  0x77   : > { %1350 = vmatmul.mubr.bf16.gmra.mrb[24].mxu1 %v2882_v59  ;;  %v2978_v59 = vld [vmem:[%s3153_s20 + $0x2c0] ss:$16 sps:$4 sm:$0xff]  }
  0x78   : > { %1357 = vmatprep.mubr.bf16.mxu1 %v2885_v60  ;;  %v2981_v60 = vld [vmem:[%s3153_s20 + $0x2e4] ss:$16 sps:$4 sm:$0xff]  }
  0x7b   : > { %1671 = vmatmul.mubr.bf16.gmra.mrb[40].mxu0 %v2905_v1  ;;  %v3001_v1 = vld [vmem:[%s3153_s20 + $0x348] ss:$16 sps:$4 sm:$0xff]  }
  0x7c   : > { %2511 = vmatprep.mubr.msk.bf16.mxu0 %vm1168_vm0, %v2907_v2  ;;  %v3003_v2 = vld [vmem:[%s3153_s20 + $0x36c] ss:$16 sps:$4 sm:$0xff]  }
  0x7f   : > { %1358 = vmatmul.mubr.bf16.gmra.mrb[28].mxu1 %v2888_v63  ;;  %v2984_v63 = vld [vmem:[%s3153_s20 + $0x2e0] ss:$16 sps:$4 sm:$0xff]  }
  0x80   : > { %1365 = vmatprep.mubr.bf16.mxu1 %v2891_v0  ;;  %v2987_v0 = vld [vmem:[%s3153_s20 + $0x304] ss:$16 sps:$4 sm:$0xff]  }
  0x83   : > { %1679 = vmatmul.mubr.bf16.gmra.mrb[44].mxu0 %v2911_v5 }
  0x84   : > { %2512 = vmatprep.mubr.msk.bf16.mxu0 %vm1168_vm0, %v2913_v6 }
  0x87   : > { %1366 = vmatmul.mubr.bf16.gmra.mrb[32].mxu1 %v2894_v3  ;;  %v2990_v3 = vld [vmem:[%s3153_s20 + $0x300] ss:$16 sps:$4 sm:$0xff]  }
  0x88   : > { %1373 = vmatprep.mubr.bf16.mxu1 %v2897_v4  ;;  %v2993_v4 = vld [vmem:[%s3153_s20 + $0x324] ss:$16 sps:$4 sm:$0xff]  }
  0x8b   : > { %1687 = vmatmul.mubr.bf16.gmra.mrb[48].mxu0 %v2917_v9  ;;  %v3009_v9 = vld [vmem:[%s3153_s20 + $0x38c] ss:$16 sps:$4 sm:$0xff]  }
  0x8c   : > { %2513 = vmatprep.mubr.msk.bf16.mxu0 %vm1168_vm0, %v2919_v10 }
  0x8f   : > { %1374 = vmatmul.mubr.bf16.gmra.mrb[36].mxu1 %v2900_v7  ;;  %v3007_v7 = vld [vmem:[%s3153_s20 + $0x368] ss:$16 sps:$4 sm:$0xff]  }
  0x90   : > { %1381 = vmatprep.mubr.bf16.mxu1 %v2903_v8 }
  0x93   : > { %1695 = vmatmul.mubr.bf16.gmra.mrb[52].mxu0 %v2923_v13 }
  0x94   : > { %2514 = vmatprep.mubr.msk.bf16.mxu0 %vm1168_vm0, %v2925_v14 }
  0x97   : > { %1382 = vmatmul.mubr.bf16.gmra.mrb[40].mxu1 %v2906_v11  ;;  %v2996_v11 = vld [vmem:[%s3153_s20 + $0x320] ss:$16 sps:$4 sm:$0xff]  }
  0x98   : > { %1389 = vmatprep.mubr.bf16.mxu1 %v2909_v12  ;;  %v2999_v12 = vld [vmem:[%s3153_s20 + $0x344] ss:$16 sps:$4 sm:$0xff]  }
  0x9b   : > { %1703 = vmatmul.mubr.bf16.gmra.mrb[56].mxu0 %v2929_v17  ;;  %v3015_v17 = vld [vmem:[%s3153_s20 + $0x3ac] ss:$16 sps:$4 sm:$0xff]  }
  0x9c   : > { %2515 = vmatprep.mubr.msk.bf16.mxu0 %vm1168_vm0, %v2931_v18 }
  0x9f   : > { %1390 = vmatmul.mubr.bf16.gmra.mrb[44].mxu1 %v2912_v15  ;;  %v3013_v15 = vld [vmem:[%s3153_s20 + $0x388] ss:$16 sps:$4 sm:$0xff]  }
  0xa0   : > { %1397 = vmatprep.mubr.bf16.mxu1 %v2915_v16 }
  0xa3   : > { %1711 = vmatmul.mubr.bf16.gmra.mrb[60].mxu0 %v2935_v21 }
  0xa4   : > { %2516 = vmatprep.mubr.msk.bf16.mxu0 %vm1168_vm0, %v2937_v22 }
  0xa7   : > { %1398 = vmatmul.mubr.bf16.gmra.mrb[48].mxu1 %v2918_v19  ;;  %v3002_v19 = vld [vmem:[%s3153_s20 + $0x340] ss:$16 sps:$4 sm:$0xff]  }
  0xa8   : > { %1405 = vmatprep.mubr.bf16.mxu1 %v2921_v20  ;;  %v3005_v20 = vld [vmem:[%s3153_s20 + $0x364] ss:$16 sps:$4 sm:$0xff]  }
  0xab   : > { %1719 = vmatmul.mubr.bf16.gmra.mrb[64].mxu0 %v2941_v25  ;;  %v3021_v25 = vld [vmem:[%s3153_s20 + $0x3cc] ss:$16 sps:$4 sm:$0xff]  }
  0xac   : > { %2517 = vmatprep.mubr.msk.bf16.mxu0 %vm1168_vm0, %v2943_v26  ;;  %v3361_v26 = vld [vmem:[%s3605_s2] ss:$0 sm:$0xff] }
  0xaf   : > { %1406 = vmatmul.mubr.bf16.gmra.mrb[52].mxu1 %v2924_v23  ;;  %v3019_v23 = vld [vmem:[%s3153_s20 + $0x3a8] ss:$16 sps:$4 sm:$0xff]  }
  0xb0   : > { %1413 = vmatprep.mubr.bf16.mxu1 %v2927_v24 }
  0xb3   : > { %1727 = vmatmul.mubr.bf16.gmra.mrb[68].mxu0 %v2947_v29 }
  0xb4   : > { %2518 = vmatprep.mubr.msk.bf16.mxu0 %vm1168_vm0, %v2949_v30 }
  0xb7   : > { %1414 = vmatmul.mubr.bf16.gmra.mrb[56].mxu1 %v2930_v27 }
  0xb8   : > { %1421 = vmatprep.mubr.bf16.mxu1 %v2933_v28 }
  0xbb   : > { %1735 = vmatmul.mubr.bf16.gmra.mrb[72].mxu0 %v2953_v33  ;;  %v3011_v33 = vld [vmem:[%s3153_s20 + $0x384] ss:$16 sps:$4 sm:$0xff]  }
  0xbc   : > { %2519 = vmatprep.mubr.msk.bf16.mxu0 %vm1168_vm0, %v2955_v34 }
  0xbf   : > { %1422 = vmatmul.mubr.bf16.gmra.mrb[60].mxu1 %v2936_v31  ;;  %v3008_v31 = vld [vmem:[%s3153_s20 + $0x360] ss:$16 sps:$4 sm:$0xff]  }
  0xc0   : > { %1429 = vmatprep.mubr.bf16.mxu1 %v2939_v32 }
  0xc3   : > { %1743 = vmatmul.mubr.bf16.gmra.mrb[76].mxu0 %v2959_v37 }
  0xc4   : > { %2520 = vmatprep.mubr.msk.bf16.mxu0 %vm1168_vm0, %v2961_v38 }
  0xc7   : > { %1430 = vmatmul.mubr.bf16.gmra.mrb[64].mxu1 %v2942_v35 }
  0xc8   : > { %1437 = vmatprep.mubr.bf16.mxu1 %v2945_v36 }
  0xcb   : > { %1751 = vmatmul.mubr.bf16.gmra.mrb[80].mxu0 %v2965_v41 }
  0xcc   : > { %2521 = vmatprep.mubr.msk.bf16.mxu0 %vm1168_vm0, %v2967_v42 }
  0xcf   : > { %1438 = vmatmul.mubr.bf16.gmra.mrb[68].mxu1 %v2948_v39  ;;  %v3025_v39 = vld [vmem:[%s3153_s20 + $0x3c8] ss:$16 sps:$4 sm:$0xff]  }
  0xd0   : > { %1445 = vmatprep.mubr.bf16.mxu1 %v2951_v40 }
  0xd3   : > { %1759 = vmatmul.mubr.bf16.gmra.mrb[84].mxu0 %v2971_v45 }
  0xd4   : > { %2522 = vmatprep.mubr.msk.bf16.mxu0 %vm1168_vm0, %v2973_v46 }
  0xd7   : > { %1446 = vmatmul.mubr.bf16.gmra.mrb[72].mxu1 %v2954_v43  ;;  %v3027_v43 = vld [vmem:[%s3153_s20 + $0x3ec] ss:$16 sps:$4 sm:$0xff]  }
  0xd8   : > { %1453 = vmatprep.mubr.bf16.mxu1 %v2957_v44 }
  0xdb   : > { %1767 = vmatmul.mubr.bf16.gmra.mrb[88].mxu0 %v2977_v49 }
  0xdc   : > { %2523 = vmatprep.mubr.msk.bf16.mxu0 %vm1168_vm0, %v2979_v50 }
  0xdf   : > { %1454 = vmatmul.mubr.bf16.gmra.mrb[76].mxu1 %v2960_v47 }
  0xe0   : > { %1461 = vmatprep.mubr.bf16.mxu1 %v2963_v48 }
  0xe3   : > { %1775 = vmatmul.mubr.bf16.gmra.mrb[92].mxu0 %v2983_v53  ;;  %v3017_v53 = vld [vmem:[%s3153_s20 + $0x3a4] ss:$16 sps:$4 sm:$0xff]  }
  0xe4   : > { %2524 = vmatprep.mubr.msk.bf16.mxu0 %vm1168_vm0, %v2985_v54 }
  0xe7   : > { %1462 = vmatmul.mubr.bf16.gmra.mrb[80].mxu1 %v2966_v51  ;;  %v3014_v51 = vld [vmem:[%s3153_s20 + $0x380] ss:$16 sps:$4 sm:$0xff]  }
  0xe8   : > { %1469 = vmatprep.mubr.bf16.mxu1 %v2969_v52 }
  0xeb   : > { %1783 = vmatmul.mubr.bf16.gmra.mrb[96].mxu0 %v2989_v57 }
  0xec   : > { %2525 = vmatprep.mubr.msk.bf16.mxu0 %vm1168_vm0, %v2991_v58 }
  0xef   : > { %1470 = vmatmul.mubr.bf16.gmra.mrb[84].mxu1 %v2972_v55 }
  0xf0   : > { %1477 = vmatprep.mubr.bf16.mxu1 %v2975_v56 }
  0xf3   : > { %1791 = vmatmul.mubr.bf16.gmra.mrb[100].mxu0 %v2995_v61 }
  0xf4   : > { %2526 = vmatprep.mubr.msk.bf16.mxu0 %vm1168_vm0, %v2997_v62 }
  0xf7   : > { %1478 = vmatmul.mubr.bf16.gmra.mrb[88].mxu1 %v2978_v59  ;;  %v3031_v59 = vld [vmem:[%s3153_s20 + $0x3e8] ss:$16 sps:$4 sm:$0xff]  }
  0xf8   : > { %1485 = vmatprep.mubr.bf16.mxu1 %v2981_v60 }
  0xfb   : > { %1799 = vmatmul.mubr.bf16.gmra.mrb[104].mxu0 %v3001_v1 }
  0xfc   : > { %2527 = vmatprep.mubr.msk.bf16.mxu0 %vm1168_vm0, %v3003_v2 }
  0xfe   : > { %v1592_v5 = vpop.f32.mrb[0].mxu0 }
  0xff   : > { %1486 = vmatmul.mubr.bf16.gmra.mrb[92].mxu1 %v2984_v63  ;;  %v1594_v6 = vpop.f32.mrb[1].mxu0 }
 0x100   : > { %1493 = vmatprep.mubr.bf16.mxu1 %v2987_v0  ;;  %v1595_v8 = vpop.f32.mrb[2].mxu0  ;;  %v3020_v6 = vld [vmem:[%s3153_s20 + $0x3a0] ss:$16 sps:$4 sm:$0xff]  }
 0x101   : > { %v1597_v10 = vpop.f32.mrb[3].mxu0 }
 0x103   : > { %1807 = vmatmul.mubr.bf16.gmra.mrb[108].mxu0 %v3007_v7 }
 0x104   : > { %2528 = vmatprep.mubr.msk.bf16.mxu0 %vm1168_vm0, %v3009_v9 }
 0x106   : > { %v1600_v13 = vpop.f32.mrb[4].mxu0 }
 0x107   : > { %1494 = vmatmul.mubr.bf16.gmra.mrb[96].mxu1 %v2990_v3  ;;  %v1602_v14 = vpop.f32.mrb[5].mxu0 }
 0x108   : > { %1501 = vmatprep.mubr.bf16.mxu1 %v2993_v4  ;;  %v1603_v16 = vpop.f32.mrb[6].mxu0 }
 0x109   : > { %v1605_v18 = vpop.f32.mrb[7].mxu0 }
 0x10b   : > { %1815 = vmatmul.mubr.bf16.gmra.mrb[112].mxu0 %v3013_v15 }
 0x10c   : > { %2529 = vmatprep.mubr.msk.bf16.mxu0 %vm1168_vm0, %v3015_v17 }
 0x10e   : > { %v3352_v21 = vpop.f32.mrb[8].mxu0 }
 0x10f   : > { %1502 = vmatmul.mubr.bf16.gmra.mrb[100].mxu1 %v2996_v11  ;;  %v1610_v22 = vpop.f32.mrb[9].mxu0 }
 0x110   : > { %1509 = vmatprep.mubr.bf16.mxu1 %v2999_v12  ;;  %v3355_v24 = vpop.f32.mrb[10].mxu0 }
 0x111   : > { %v1613_v27 = vpop.f32.mrb[11].mxu0 }
 0x113   : > { %1823 = vmatmul.mubr.bf16.gmra.mrb[116].mxu0 %v3019_v23 }
 0x114   : > { %2530 = vmatprep.mubr.msk.bf16.mxu0 %vm1168_vm0, %v3021_v25  ;;  %v3026_v25 = vld [vmem:[%s3153_s20 + $0x3c0] ss:$16 sps:$4 sm:$0xff]  }
 0x116   : > { %v3369_v37 = vpop.f32.mrb[12].mxu0 }
 0x117   : > { %1510 = vmatmul.mubr.bf16.gmra.mrb[104].mxu1 %v3002_v19  ;;  %v1618_v38 = vpop.f32.mrb[13].mxu0 }
 0x118   : > { %1517 = vmatprep.mubr.bf16.mxu1 %v3005_v20  ;;  %v3372_v42 = vpop.f32.mrb[14].mxu0 }
 0x119   : > { %v1621_v44 = vpop.f32.mrb[15].mxu0 }
 0x11a   : > { %v1303_v28 = vpop.f32.mrb[0].mxu1  ;;  %v3032_v44 = vld [vmem:[%s3153_s20 + $0x3e0] ss:$16 sps:$4 sm:$0xff]  }
 0x11b   : > { %v1304_v29 = vadd.f32 %v3361_v26, %v1303_v28  ;;  %v1305_v30 = vpop.f32.mrb[1].mxu1  ;;  %1831 = vmatmul.mubr.bf16.gmra.mrb[120].mxu0 %v3025_v39  ;;  %v3029_v28 = vld [vmem:[%s3153_s20 + $0x3e4] ss:$16 sps:$4 sm:$0xff]  }
 0x11c   : > { %v1306_v32 = vpop.f32.mrb[2].mxu1  ;;  %2531 = vmatprep.mubr.msk.bf16.mxu0 %vm1168_vm0, %v3027_v43 }
 0x11d   : > { %v1593_v34 = vadd.f32 %v1592_v5, %v1304_v29  ;;  %v1307_v35 = vadd.f32 %v3361_v26, %v1306_v32  ;;  %v1308_v36 = vpop.f32.mrb[3].mxu1 }
 0x11e   : > { %v3389_v57 = vpop.f32.mrb[16].mxu0 }
 0x11f   : > { %v1847_v40 = vmax.f32 %v1593_v34, 0.0  ;;  %v1596_v41 = vadd.f32 %v1595_v8, %v1307_v35  ;;  %1518 = vmatmul.mubr.bf16.gmra.mrb[108].mxu1 %v3008_v31  ;;  %v1626_v58 = vpop.f32.mrb[17].mxu0  ;;  %v3023_v8 = vld [vmem:[%s3153_s20 + $0x3c4] ss:$16 sps:$4 sm:$0xff]  }
 0x120   : > { %1525 = vmatprep.mubr.bf16.mxu1 %v3011_v33  ;;  %v3392_v62 = vpop.f32.mrb[18].mxu0 }
 0x121   : > { %v2599_v45 = vpack.c.bf16 %v1847_v40, %v1847_v40  ;;  %v1848_v46 = vmax.f32 %v1596_v41, 0.0  ;;  %v1629_v63 = vpop.f32.mrb[19].mxu0 }
 0x122   : > { %v1311_v47 = vpop.f32.mrb[4].mxu1 }
 0x123   : > { %2168 = vst.msk [vmem:[%s3378_s24] sm:$0xf] %vm2167_vm2, %v2599_v45  ;;  %v2600_v48 = vpack.c.bf16 %v1848_v46, %v1848_v46  ;;  %v1312_v49 = vadd.f32 %v3361_v26, %v1311_v47  ;;  %v1313_v50 = vpop.f32.mrb[5].mxu1  ;;  %1839 = vmatmul.mubr.bf16.gmra.mrb[124].mxu0 %v3031_v59 }
 0x124   : > { %v1314_v52 = vpop.f32.mrb[6].mxu1 }
 0x125   : > { %2169 = vst.msk [vmem:[%s3378_s24 + $0x4] sm:$0xf] %vm2167_vm2, %v2600_v48  ;;  %v1601_v54 = vadd.f32 %v1600_v13, %v1312_v49  ;;  %v1315_v55 = vadd.f32 %v3361_v26, %v1314_v52  ;;  %v1316_v56 = vpop.f32.mrb[7].mxu1 }
 0x126   : > { %v1632_v12 = vpop.f32.mrb[20].mxu0 }
 0x127   : > { %v1849_v60 = vmax.f32 %v1601_v54, 0.0  ;;  %v1604_v61 = vadd.f32 %v1603_v16, %v1315_v55  ;;  %1526 = vmatmul.mubr.bf16.gmra.mrb[112].mxu1 %v3014_v51  ;;  %v1634_v13 = vpop.f32.mrb[21].mxu0 }
 0x128   : > { %1533 = vmatprep.mubr.bf16.mxu1 %v3017_v53  ;;  %v1635_v16 = vpop.f32.mrb[22].mxu0 }
 0x129   : > { %v2601_v0 = vpack.c.bf16 %v1849_v60, %v1849_v60  ;;  %v1850_v1 = vmax.f32 %v1604_v61, 0.0  ;;  %v1637_v17 = vpop.f32.mrb[23].mxu0 }
 0x12a   : > { %v1319_v2 = vpop.f32.mrb[8].mxu1 }
 0x12b   : > { %2170 = vst.msk [vmem:[%s3378_s24 + $0x8] sm:$0xf] %vm2167_vm2, %v2601_v0  ;;  %v2602_v3 = vpack.c.bf16 %v1850_v1, %v1850_v1  ;;  %v1320_v4 = vadd.f32 %v3361_v26, %v1319_v2  ;;  %v1321_v5 = vpop.f32.mrb[9].mxu1 }
 0x12c   : > { %v1322_v7 = vpop.f32.mrb[10].mxu1 }
 0x12d   : > { %2171 = vst.msk [vmem:[%s3378_s24 + $0xc] sm:$0xf] %vm2167_vm2, %v2602_v3  ;;  %v1609_v9 = vadd.f32 %v3352_v21, %v1320_v4  ;;  %v1323_v10 = vadd.f32 %v3361_v26, %v1322_v7  ;;  %v1324_v11 = vpop.f32.mrb[11].mxu1 }
 0x12e   : > { %v1640_v31 = vpop.f32.mrb[24].mxu0 }
 0x12f   : > { %v1851_v14 = vmax.f32 %v1609_v9, 0.0  ;;  %v1612_v15 = vadd.f32 %v3355_v24, %v1323_v10  ;;  %1534 = vmatmul.mubr.bf16.gmra.mrb[116].mxu1 %v3020_v6  ;;  %v1642_v32 = vpop.f32.mrb[25].mxu0 }
 0x130   : > { %1541 = vmatprep.mubr.bf16.mxu1 %v3023_v8  ;;  %v1643_v35 = vpop.f32.mrb[26].mxu0 }
 0x131   : > { %v2603_v18 = vpack.c.bf16 %v1851_v14, %v1851_v14  ;;  %v1852_v19 = vmax.f32 %v1612_v15, 0.0  ;;  %v1645_v36 = vpop.f32.mrb[27].mxu0 }
 0x132   : > { %v1327_v20 = vpop.f32.mrb[12].mxu1 }
 0x133   : > { %2172 = vst.msk [vmem:[%s3378_s24 + $0x10] sm:$0xf] %vm2167_vm2, %v2603_v18  ;;  %v2604_v21 = vpack.c.bf16 %v1852_v19, %v1852_v19  ;;  %v1328_v22 = vadd.f32 %v3361_v26, %v1327_v20  ;;  %v1329_v23 = vpop.f32.mrb[13].mxu1 }
 0x134   : > { %v1330_v27 = vpop.f32.mrb[14].mxu1 }
 0x135   : > { %2173 = vst.msk [vmem:[%s3378_s24 + $0x14] sm:$0xf] %vm2167_vm2, %v2604_v21  ;;  %v1617_v24 = vadd.f32 %v3369_v37, %v1328_v22  ;;  %v1331_v29 = vadd.f32 %v3361_v26, %v1330_v27  ;;  %v1332_v30 = vpop.f32.mrb[15].mxu1 }
 0x136   : > { %v1648_v48 = vpop.f32.mrb[28].mxu0 }
 0x137   : > { %v1853_v33 = vmax.f32 %v1617_v24, 0.0  ;;  %v1620_v34 = vadd.f32 %v3372_v42, %v1331_v29  ;;  %1542 = vmatmul.mubr.bf16.gmra.mrb[120].mxu1 %v3026_v25  ;;  %v1650_v49 = vpop.f32.mrb[29].mxu0 }
 0x138   : > { %1549 = vmatprep.mubr.bf16.mxu1 %v3029_v28  ;;  %v1651_v52 = vpop.f32.mrb[30].mxu0 }
 0x139   : > { %v2605_v38 = vpack.c.bf16 %v1853_v33, %v1853_v33  ;;  %v1854_v39 = vmax.f32 %v1620_v34, 0.0  ;;  %v1653_v53 = vpop.f32.mrb[31].mxu0 }
 0x13a   : > { %v1335_v40 = vpop.f32.mrb[16].mxu1 }
 0x13b   : > { %2174 = vst.msk [vmem:[%s3378_s24 + $0x18] sm:$0xf] %vm2167_vm2, %v2605_v38  ;;  %v2606_v37 = vpack.c.bf16 %v1854_v39, %v1854_v39  ;;  %v1336_v41 = vadd.f32 %v3361_v26, %v1335_v40  ;;  %v1337_v43 = vpop.f32.mrb[17].mxu1 }
 0x13c   : > { %v1338_v45 = vpop.f32.mrb[18].mxu1 }
 0x13d   : > { %2175 = vst.msk [vmem:[%s3378_s24 + $0x1c] sm:$0xf] %vm2167_vm2, %v2606_v37  ;;  %v1625_v42 = vadd.f32 %v3389_v57, %v1336_v41  ;;  %v1339_v46 = vadd.f32 %v3361_v26, %v1338_v45  ;;  %v1340_v47 = vpop.f32.mrb[19].mxu1 }
 0x13e   : > { %v1656_v0 = vpop.f32.mrb[32].mxu0 }
 0x13f   : > { %v1855_v50 = vmax.f32 %v1625_v42, 0.0  ;;  %v1628_v51 = vadd.f32 %v3392_v62, %v1339_v46  ;;  %1550 = vmatmul.mubr.bf16.gmra.mrb[124].mxu1 %v3032_v44  ;;  %v1658_v1 = vpop.f32.mrb[33].mxu0 }
 0x140   : > { %v1659_v4 = vpop.f32.mrb[34].mxu0 }
 0x141   : > { %v2607_v54 = vpack.c.bf16 %v1855_v50, %v1855_v50  ;;  %v1856_v55 = vmax.f32 %v1628_v51, 0.0  ;;  %v1661_v5 = vpop.f32.mrb[35].mxu0 }
 0x142   : > { %v1343_v56 = vpop.f32.mrb[20].mxu1 }
 0x143   : > { %2176 = vst.msk [vmem:[%s3378_s24 + $0x20] sm:$0xf] %vm2167_vm2, %v2607_v54  ;;  %v2608_v58 = vpack.c.bf16 %v1856_v55, %v1856_v55  ;;  %v1344_v57 = vadd.f32 %v3361_v26, %v1343_v56  ;;  %v1345_v59 = vpop.f32.mrb[21].mxu1 }
 0x144   : > { %v1346_v60 = vpop.f32.mrb[22].mxu1 }
 0x145   : > { %2177 = vst.msk [vmem:[%s3378_s24 + $0x24] sm:$0xf] %vm2167_vm2, %v2608_v58  ;;  %v1633_v61 = vadd.f32 %v1632_v12, %v1344_v57  ;;  %v1347_v63 = vadd.f32 %v3361_v26, %v1346_v60  ;;  %v1348_v62 = vpop.f32.mrb[23].mxu1 }
 0x147   : > { %v1857_v2 = vmax.f32 %v1633_v61, 0.0  ;;  %v1636_v3 = vadd.f32 %v1635_v16, %v1347_v63  ;;  %v1664_v16 = vpop.f32.mrb[36].mxu0 }
 0x148   : > { %v1666_v17 = vpop.f32.mrb[37].mxu0 }
 0x149   : > { %v2609_v6 = vpack.c.bf16 %v1857_v2, %v1857_v2  ;;  %v1858_v7 = vmax.f32 %v1636_v3, 0.0  ;;  %v1667_v20 = vpop.f32.mrb[38].mxu0 }
 0x14a   : > { %v1351_v8 = vpop.f32.mrb[24].mxu1  ;;  %v1669_v21 = vpop.f32.mrb[39].mxu0 }
 0x14b   : > { %2178 = vst.msk [vmem:[%s3378_s24 + $0x28] sm:$0xf] %vm2167_vm2, %v2609_v6  ;;  %v2610_v9 = vpack.c.bf16 %v1858_v7, %v1858_v7  ;;  %v1352_v10 = vadd.f32 %v3361_v26, %v1351_v8  ;;  %v1353_v11 = vpop.f32.mrb[25].mxu1 }
 0x14c   : > { %v1354_v12 = vpop.f32.mrb[26].mxu1 }
 0x14d   : > { %2179 = vst.msk [vmem:[%s3378_s24 + $0x2c] sm:$0xf] %vm2167_vm2, %v2610_v9  ;;  %v1641_v13 = vadd.f32 %v1640_v31, %v1352_v10  ;;  %v1355_v14 = vadd.f32 %v3361_v26, %v1354_v12  ;;  %v1356_v15 = vpop.f32.mrb[27].mxu1 }
 0x14e   : > { %v1672_v33 = vpop.f32.mrb[40].mxu0 }
 0x14f   : > { %v1859_v18 = vmax.f32 %v1641_v13, 0.0  ;;  %v1644_v19 = vadd.f32 %v1643_v35, %v1355_v14  ;;  %v1674_v34 = vpop.f32.mrb[41].mxu0 }
 0x150   : > { %v1675_v38 = vpop.f32.mrb[42].mxu0 }
 0x151   : > { %v2611_v22 = vpack.c.bf16 %v1859_v18, %v1859_v18  ;;  %v1860_v23 = vmax.f32 %v1644_v19, 0.0  ;;  %v1677_v39 = vpop.f32.mrb[43].mxu0 }
 0x152   : > { %v1359_v25 = vpop.f32.mrb[28].mxu1 }
 0x153   : > { %2180 = vst.msk [vmem:[%s3378_s24 + $0x30] sm:$0xf] %vm2167_vm2, %v2611_v22  ;;  %v2612_v27 = vpack.c.bf16 %v1860_v23, %v1860_v23  ;;  %v1360_v28 = vadd.f32 %v3361_v26, %v1359_v25  ;;  %v1361_v24 = vpop.f32.mrb[29].mxu1 }
 0x154   : > { %v1362_v29 = vpop.f32.mrb[30].mxu1 }
 0x155   : > { %2181 = vst.msk [vmem:[%s3378_s24 + $0x34] sm:$0xf] %vm2167_vm2, %v2612_v27  ;;  %v1649_v30 = vadd.f32 %v1648_v48, %v1360_v28  ;;  %v1363_v31 = vadd.f32 %v3361_v26, %v1362_v29  ;;  %v1364_v32 = vpop.f32.mrb[31].mxu1 }
 0x156   : > { %v1680_v49 = vpop.f32.mrb[44].mxu0 }
 0x157   : > { %v1861_v35 = vmax.f32 %v1649_v30, 0.0  ;;  %v1652_v36 = vadd.f32 %v1651_v52, %v1363_v31  ;;  %v1682_v50 = vpop.f32.mrb[45].mxu0 }
 0x158   : > { %v1683_v53 = vpop.f32.mrb[46].mxu0 }
 0x159   : > { %v2613_v40 = vpack.c.bf16 %v1861_v35, %v1861_v35  ;;  %v1862_v37 = vmax.f32 %v1652_v36, 0.0  ;;  %v1685_v54 = vpop.f32.mrb[47].mxu0 }
 0x15a   : > { %v1367_v41 = vpop.f32.mrb[32].mxu1 }
 0x15b   : > { %2182 = vst.msk [vmem:[%s3378_s24 + $0x38] sm:$0xf] %vm2167_vm2, %v2613_v40  ;;  %v2614_v43 = vpack.c.bf16 %v1862_v37, %v1862_v37  ;;  %v1368_v44 = vadd.f32 %v3361_v26, %v1367_v41  ;;  %v1369_v45 = vpop.f32.mrb[33].mxu1 }
 0x15c   : > { %v1370_v42 = vpop.f32.mrb[34].mxu1 }
 0x15d   : > { %2183 = vst.msk [vmem:[%s3378_s24 + $0x3c] sm:$0xf] %vm2167_vm2, %v2614_v43  ;;  %v1657_v46 = vadd.f32 %v1656_v0, %v1368_v44  ;;  %v1371_v47 = vadd.f32 %v3361_v26, %v1370_v42  ;;  %v1372_v48 = vpop.f32.mrb[35].mxu1 }
 0x15e   : > { %v1688_v1 = vpop.f32.mrb[48].mxu0 }
 0x15f   : > { %v1863_v51 = vmax.f32 %v1657_v46, 0.0  ;;  %v1660_v52 = vadd.f32 %v1659_v4, %v1371_v47  ;;  %v1690_v2 = vpop.f32.mrb[49].mxu0 }
 0x160   : > { %v1691_v5 = vpop.f32.mrb[50].mxu0 }
 0x161   : > { %v2615_v55 = vpack.c.bf16 %v1863_v51, %v1863_v51  ;;  %v1864_v56 = vmax.f32 %v1660_v52, 0.0  ;;  %v1693_v6 = vpop.f32.mrb[51].mxu0 }
 0x162   : > { %v1375_v58 = vpop.f32.mrb[36].mxu1 }
 0x163   : > { %2184 = vst.msk [vmem:[%s3378_s24 + $0x40] sm:$0xf] %vm2167_vm2, %v2615_v55  ;;  %v2616_v57 = vpack.c.bf16 %v1864_v56, %v1864_v56  ;;  %v1376_v59 = vadd.f32 %v3361_v26, %v1375_v58  ;;  %v1377_v60 = vpop.f32.mrb[37].mxu1 }
 0x164   : > { %v1378_v61 = vpop.f32.mrb[38].mxu1 }
 0x165   : > { %2185 = vst.msk [vmem:[%s3378_s24 + $0x44] sm:$0xf] %vm2167_vm2, %v2616_v57  ;;  %v1665_v63 = vadd.f32 %v1664_v16, %v1376_v59  ;;  %v1379_v62 = vadd.f32 %v3361_v26, %v1378_v61  ;;  %v1380_v0 = vpop.f32.mrb[39].mxu1 }
 0x166   : > { %v1696_v17 = vpop.f32.mrb[52].mxu0 }
 0x167   : > { %v1865_v3 = vmax.f32 %v1665_v63, 0.0  ;;  %v1668_v4 = vadd.f32 %v1667_v20, %v1379_v62  ;;  %v1698_v18 = vpop.f32.mrb[53].mxu0 }
 0x168   : > { %v1699_v21 = vpop.f32.mrb[54].mxu0 }
 0x169   : > { %v2617_v7 = vpack.c.bf16 %v1865_v3, %v1865_v3  ;;  %v1866_v8 = vmax.f32 %v1668_v4, 0.0  ;;  %v1701_v22 = vpop.f32.mrb[55].mxu0 }
 0x16a   : > { %v1383_v9 = vpop.f32.mrb[40].mxu1 }
 0x16b   : > { %2186 = vst.msk [vmem:[%s3378_s24 + $0x48] sm:$0xf] %vm2167_vm2, %v2617_v7  ;;  %v2618_v10 = vpack.c.bf16 %v1866_v8, %v1866_v8  ;;  %v1384_v11 = vadd.f32 %v3361_v26, %v1383_v9  ;;  %v1385_v12 = vpop.f32.mrb[41].mxu1 }
 0x16c   : > { %v1386_v13 = vpop.f32.mrb[42].mxu1 }
 0x16d   : > { %2187 = vst.msk [vmem:[%s3378_s24 + $0x4c] sm:$0xf] %vm2167_vm2, %v2618_v10  ;;  %v1673_v14 = vadd.f32 %v1672_v33, %v1384_v11  ;;  %v1387_v15 = vadd.f32 %v3361_v26, %v1386_v13  ;;  %v1388_v16 = vpop.f32.mrb[43].mxu1 }
 0x16e   : > { %v1704_v34 = vpop.f32.mrb[56].mxu0 }
 0x16f   : > { %v1867_v19 = vmax.f32 %v1673_v14, 0.0  ;;  %v1676_v20 = vadd.f32 %v1675_v38, %v1387_v15  ;;  %v1706_v35 = vpop.f32.mrb[57].mxu0 }
 0x170   : > { %v1707_v39 = vpop.f32.mrb[58].mxu0 }
 0x171   : > { %v2619_v23 = vpack.c.bf16 %v1867_v19, %v1867_v19  ;;  %v1868_v25 = vmax.f32 %v1676_v20, 0.0  ;;  %v1709_v40 = vpop.f32.mrb[59].mxu0 }
 0x172   : > { %v1391_v27 = vpop.f32.mrb[44].mxu1 }
 0x173   : > { %2188 = vst.msk [vmem:[%s3378_s24 + $0x50] sm:$0xf] %vm2167_vm2, %v2619_v23  ;;  %v2620_v28 = vpack.c.bf16 %v1868_v25, %v1868_v25  ;;  %v1392_v24 = vadd.f32 %v3361_v26, %v1391_v27  ;;  %v1393_v29 = vpop.f32.mrb[45].mxu1 }
 0x174   : > { %v1394_v30 = vpop.f32.mrb[46].mxu1 }
 0x175   : > { %2189 = vst.msk [vmem:[%s3378_s24 + $0x54] sm:$0xf] %vm2167_vm2, %v2620_v28  ;;  %v1681_v31 = vadd.f32 %v1680_v49, %v1392_v24  ;;  %v1395_v32 = vadd.f32 %v3361_v26, %v1394_v30  ;;  %v1396_v33 = vpop.f32.mrb[47].mxu1 }
 0x176   : > { %v1712_v50 = vpop.f32.mrb[60].mxu0 }
 0x177   : > { %v1869_v36 = vmax.f32 %v1681_v31, 0.0  ;;  %v1684_v38 = vadd.f32 %v1683_v53, %v1395_v32  ;;  %v1714_v51 = vpop.f32.mrb[61].mxu0 }
 0x178   : > { %v1715_v54 = vpop.f32.mrb[62].mxu0 }
 0x179   : > { %v2621_v37 = vpack.c.bf16 %v1869_v36, %v1869_v36  ;;  %v1870_v41 = vmax.f32 %v1684_v38, 0.0  ;;  %v1717_v55 = vpop.f32.mrb[63].mxu0 }
 0x17a   : > { %v1399_v43 = vpop.f32.mrb[48].mxu1 }
 0x17b   : > { %2190 = vst.msk [vmem:[%s3378_s24 + $0x58] sm:$0xf] %vm2167_vm2, %v2621_v37  ;;  %v2622_v44 = vpack.c.bf16 %v1870_v41, %v1870_v41  ;;  %v1400_v45 = vadd.f32 %v3361_v26, %v1399_v43  ;;  %v1401_v42 = vpop.f32.mrb[49].mxu1 }
 0x17c   : > { %v1402_v46 = vpop.f32.mrb[50].mxu1 }
 0x17d   : > { %2191 = vst.msk [vmem:[%s3378_s24 + $0x5c] sm:$0xf] %vm2167_vm2, %v2622_v44  ;;  %v1689_v47 = vadd.f32 %v1688_v1, %v1400_v45  ;;  %v1403_v48 = vadd.f32 %v3361_v26, %v1402_v46  ;;  %v1404_v49 = vpop.f32.mrb[51].mxu1 }
 0x17e   : > { %v1720_v2 = vpop.f32.mrb[64].mxu0 }
 0x17f   : > { %v1871_v52 = vmax.f32 %v1689_v47, 0.0  ;;  %v1692_v53 = vadd.f32 %v1691_v5, %v1403_v48  ;;  %v1722_v3 = vpop.f32.mrb[65].mxu0 }
 0x180   : > { %v1723_v6 = vpop.f32.mrb[66].mxu0 }
 0x181   : > { %v2623_v56 = vpack.c.bf16 %v1871_v52, %v1871_v52  ;;  %v1872_v58 = vmax.f32 %v1692_v53, 0.0  ;;  %v1725_v7 = vpop.f32.mrb[67].mxu0 }
 0x182   : > { %v1407_v57 = vpop.f32.mrb[52].mxu1 }
 0x183   : > { %2192 = vst.msk [vmem:[%s3378_s24 + $0x60] sm:$0xf] %vm2167_vm2, %v2623_v56  ;;  %v2624_v59 = vpack.c.bf16 %v1872_v58, %v1872_v58  ;;  %v1408_v60 = vadd.f32 %v3361_v26, %v1407_v57  ;;  %v1409_v61 = vpop.f32.mrb[53].mxu1 }
 0x184   : > { %v1410_v63 = vpop.f32.mrb[54].mxu1 }
 0x185   : > { %2193 = vst.msk [vmem:[%s3378_s24 + $0x64] sm:$0xf] %vm2167_vm2, %v2624_v59  ;;  %v1697_v62 = vadd.f32 %v1696_v17, %v1408_v60  ;;  %v1411_v0 = vadd.f32 %v3361_v26, %v1410_v63  ;;  %v1412_v1 = vpop.f32.mrb[55].mxu1 }
 0x186   : > { %v1728_v18 = vpop.f32.mrb[68].mxu0 }
 0x187   : > { %v1873_v4 = vmax.f32 %v1697_v62, 0.0  ;;  %v1700_v5 = vadd.f32 %v1699_v21, %v1411_v0  ;;  %v1730_v19 = vpop.f32.mrb[69].mxu0 }
 0x188   : > { %v1731_v22 = vpop.f32.mrb[70].mxu0 }
 0x189   : > { %v2625_v8 = vpack.c.bf16 %v1873_v4, %v1873_v4  ;;  %v1874_v9 = vmax.f32 %v1700_v5, 0.0  ;;  %v1733_v23 = vpop.f32.mrb[71].mxu0 }
 0x18a   : > { %v1415_v10 = vpop.f32.mrb[56].mxu1 }
 0x18b   : > { %2194 = vst.msk [vmem:[%s3378_s24 + $0x68] sm:$0xf] %vm2167_vm2, %v2625_v8  ;;  %v2626_v11 = vpack.c.bf16 %v1874_v9, %v1874_v9  ;;  %v1416_v12 = vadd.f32 %v3361_v26, %v1415_v10  ;;  %v1417_v13 = vpop.f32.mrb[57].mxu1 }
 0x18c   : > { %v1418_v14 = vpop.f32.mrb[58].mxu1 }
 0x18d   : > { %2195 = vst.msk [vmem:[%s3378_s24 + $0x6c] sm:$0xf] %vm2167_vm2, %v2626_v11  ;;  %v1705_v15 = vadd.f32 %v1704_v34, %v1416_v12  ;;  %v1419_v16 = vadd.f32 %v3361_v26, %v1418_v14  ;;  %v1420_v17 = vpop.f32.mrb[59].mxu1 }
 0x18e   : > { %v1736_v35 = vpop.f32.mrb[72].mxu0 }
 0x18f   : > { %v1875_v20 = vmax.f32 %v1705_v15, 0.0  ;;  %v1708_v21 = vadd.f32 %v1707_v39, %v1419_v16  ;;  %v1738_v36 = vpop.f32.mrb[73].mxu0 }
 0x190   : > { %v1739_v40 = vpop.f32.mrb[74].mxu0 }
 0x191   : > { %v2627_v25 = vpack.c.bf16 %v1875_v20, %v1875_v20  ;;  %v1876_v27 = vmax.f32 %v1708_v21, 0.0  ;;  %v1741_v37 = vpop.f32.mrb[75].mxu0 }
 0x192   : > { %v1423_v28 = vpop.f32.mrb[60].mxu1 }
 0x193   : > { %2196 = vst.msk [vmem:[%s3378_s24 + $0x70] sm:$0xf] %vm2167_vm2, %v2627_v25  ;;  %v2628_v24 = vpack.c.bf16 %v1876_v27, %v1876_v27  ;;  %v1424_v29 = vadd.f32 %v3361_v26, %v1423_v28  ;;  %v1425_v30 = vpop.f32.mrb[61].mxu1 }
 0x194   : > { %v1426_v31 = vpop.f32.mrb[62].mxu1 }
 0x195   : > { %2197 = vst.msk [vmem:[%s3378_s24 + $0x74] sm:$0xf] %vm2167_vm2, %v2628_v24  ;;  %v1713_v32 = vadd.f32 %v1712_v50, %v1424_v29  ;;  %v1427_v33 = vadd.f32 %v3361_v26, %v1426_v31  ;;  %v1428_v34 = vpop.f32.mrb[63].mxu1 }
 0x196   : > { %v1744_v51 = vpop.f32.mrb[76].mxu0 }
 0x197   : > { %v1877_v38 = vmax.f32 %v1713_v32, 0.0  ;;  %v1716_v39 = vadd.f32 %v1715_v54, %v1427_v33  ;;  %v1746_v52 = vpop.f32.mrb[77].mxu0 }
 0x198   : > { %v1747_v55 = vpop.f32.mrb[78].mxu0 }
 0x199   : > { %v2629_v41 = vpack.c.bf16 %v1877_v38, %v1877_v38  ;;  %v1878_v43 = vmax.f32 %v1716_v39, 0.0  ;;  %v1749_v56 = vpop.f32.mrb[79].mxu0 }
 0x19a   : > { %v1431_v44 = vpop.f32.mrb[64].mxu1 }
 0x19b   : > { %2198 = vst.msk [vmem:[%s3378_s24 + $0x78] sm:$0xf] %vm2167_vm2, %v2629_v41  ;;  %v2630_v45 = vpack.c.bf16 %v1878_v43, %v1878_v43  ;;  %v1432_v42 = vadd.f32 %v3361_v26, %v1431_v44  ;;  %v1433_v46 = vpop.f32.mrb[65].mxu1 }
 0x19c   : > { %v1434_v47 = vpop.f32.mrb[66].mxu1 }
 0x19d   : > { %2199 = vst.msk [vmem:[%s3378_s24 + $0x7c] sm:$0xf] %vm2167_vm2, %v2630_v45  ;;  %v1721_v48 = vadd.f32 %v1720_v2, %v1432_v42  ;;  %v1435_v49 = vadd.f32 %v3361_v26, %v1434_v47  ;;  %v1436_v50 = vpop.f32.mrb[67].mxu1 }
 0x19e   : > { %v1752_v3 = vpop.f32.mrb[80].mxu0 }
 0x19f   : > { %v1879_v53 = vmax.f32 %v1721_v48, 0.0  ;;  %v1724_v54 = vadd.f32 %v1723_v6, %v1435_v49  ;;  %v1754_v4 = vpop.f32.mrb[81].mxu0 }
 0x1a0   : > { %v1755_v7 = vpop.f32.mrb[82].mxu0 }
 0x1a1   : > { %v2631_v58 = vpack.c.bf16 %v1879_v53, %v1879_v53  ;;  %v1880_v57 = vmax.f32 %v1724_v54, 0.0  ;;  %v1757_v8 = vpop.f32.mrb[83].mxu0 }
 0x1a2   : > { %v1439_v59 = vpop.f32.mrb[68].mxu1 }
 0x1a3   : > { %2200 = vst.msk [vmem:[%s3378_s24 + $0x80] sm:$0xf] %vm2167_vm2, %v2631_v58  ;;  %v2632_v60 = vpack.c.bf16 %v1880_v57, %v1880_v57  ;;  %v1440_v61 = vadd.f32 %v3361_v26, %v1439_v59  ;;  %v1441_v63 = vpop.f32.mrb[69].mxu1 }
 0x1a4   : > { %v1442_v62 = vpop.f32.mrb[70].mxu1 }
 0x1a5   : > { %2201 = vst.msk [vmem:[%s3378_s24 + $0x84] sm:$0xf] %vm2167_vm2, %v2632_v60  ;;  %v1729_v0 = vadd.f32 %v1728_v18, %v1440_v61  ;;  %v1443_v1 = vadd.f32 %v3361_v26, %v1442_v62  ;;  %v1444_v2 = vpop.f32.mrb[71].mxu1 }
 0x1a6   : > { %v1760_v19 = vpop.f32.mrb[84].mxu0 }
 0x1a7   : > { %v1881_v5 = vmax.f32 %v1729_v0, 0.0  ;;  %v1732_v6 = vadd.f32 %v1731_v22, %v1443_v1  ;;  %v1762_v20 = vpop.f32.mrb[85].mxu0 }
 0x1a8   : > { %v1763_v23 = vpop.f32.mrb[86].mxu0 }
 0x1a9   : > { %v2633_v9 = vpack.c.bf16 %v1881_v5, %v1881_v5  ;;  %v1882_v10 = vmax.f32 %v1732_v6, 0.0  ;;  %v1765_v25 = vpop.f32.mrb[87].mxu0 }
 0x1aa   : > { %v1447_v11 = vpop.f32.mrb[72].mxu1 }
 0x1ab   : > { %2202 = vst.msk [vmem:[%s3378_s24 + $0x88] sm:$0xf] %vm2167_vm2, %v2633_v9  ;;  %v2634_v12 = vpack.c.bf16 %v1882_v10, %v1882_v10  ;;  %v1448_v13 = vadd.f32 %v3361_v26, %v1447_v11  ;;  %v1449_v14 = vpop.f32.mrb[73].mxu1 }
 0x1ac   : > { %v1450_v15 = vpop.f32.mrb[74].mxu1 }
 0x1ad   : > { %2203 = vst.msk [vmem:[%s3378_s24 + $0x8c] sm:$0xf] %vm2167_vm2, %v2634_v12  ;;  %v1737_v16 = vadd.f32 %v1736_v35, %v1448_v13  ;;  %v1451_v17 = vadd.f32 %v3361_v26, %v1450_v15  ;;  %v1452_v18 = vpop.f32.mrb[75].mxu1 }
 0x1ae   : > { %v1768_v36 = vpop.f32.mrb[88].mxu0 }
 0x1af   : > { %v1883_v21 = vmax.f32 %v1737_v16, 0.0  ;;  %v1740_v22 = vadd.f32 %v1739_v40, %v1451_v17  ;;  %v1770_v38 = vpop.f32.mrb[89].mxu0 }
 0x1b0   : > { %v1771_v37 = vpop.f32.mrb[90].mxu0 }
 0x1b1   : > { %v2635_v27 = vpack.c.bf16 %v1883_v21, %v1883_v21  ;;  %v1884_v28 = vmax.f32 %v1740_v22, 0.0  ;;  %v1773_v41 = vpop.f32.mrb[91].mxu0 }
 0x1b2   : > { %v1455_v24 = vpop.f32.mrb[76].mxu1 }
 0x1b3   : > { %2204 = vst.msk [vmem:[%s3378_s24 + $0x90] sm:$0xf] %vm2167_vm2, %v2635_v27  ;;  %v2636_v29 = vpack.c.bf16 %v1884_v28, %v1884_v28  ;;  %v1456_v30 = vadd.f32 %v3361_v26, %v1455_v24  ;;  %v1457_v31 = vpop.f32.mrb[77].mxu1 }
 0x1b4   : > { %v1458_v32 = vpop.f32.mrb[78].mxu1 }
 0x1b5   : > { %2205 = vst.msk [vmem:[%s3378_s24 + $0x94] sm:$0xf] %vm2167_vm2, %v2636_v29  ;;  %v1745_v33 = vadd.f32 %v1744_v51, %v1456_v30  ;;  %v1459_v34 = vadd.f32 %v3361_v26, %v1458_v32  ;;  %v1460_v35 = vpop.f32.mrb[79].mxu1 }
 0x1b6   : > { %v1776_v52 = vpop.f32.mrb[92].mxu0 }
 0x1b7   : > { %v1885_v39 = vmax.f32 %v1745_v33, 0.0  ;;  %v1748_v40 = vadd.f32 %v1747_v55, %v1459_v34  ;;  %v1778_v53 = vpop.f32.mrb[93].mxu0 }
 0x1b8   : > { %v1779_v56 = vpop.f32.mrb[94].mxu0 }
 0x1b9   : > { %v2637_v43 = vpack.c.bf16 %v1885_v39, %v1885_v39  ;;  %v1886_v44 = vmax.f32 %v1748_v40, 0.0  ;;  %v1781_v58 = vpop.f32.mrb[95].mxu0 }
 0x1ba   : > { %v1463_v45 = vpop.f32.mrb[80].mxu1 }
 0x1bb   : > { %2206 = vst.msk [vmem:[%s3378_s24 + $0x98] sm:$0xf] %vm2167_vm2, %v2637_v43  ;;  %v2638_v42 = vpack.c.bf16 %v1886_v44, %v1886_v44  ;;  %v1464_v46 = vadd.f32 %v3361_v26, %v1463_v45  ;;  %v1465_v47 = vpop.f32.mrb[81].mxu1 }
 0x1bc   : > { %v1466_v48 = vpop.f32.mrb[82].mxu1 }
 0x1bd   : > { %2207 = vst.msk [vmem:[%s3378_s24 + $0x9c] sm:$0xf] %vm2167_vm2, %v2638_v42  ;;  %v1753_v49 = vadd.f32 %v1752_v3, %v1464_v46  ;;  %v1467_v50 = vadd.f32 %v3361_v26, %v1466_v48  ;;  %v1468_v51 = vpop.f32.mrb[83].mxu1 }
 0x1be   : > { %v1784_v4 = vpop.f32.mrb[96].mxu0 }
 0x1bf   : > { %v1887_v54 = vmax.f32 %v1753_v49, 0.0  ;;  %v1756_v55 = vadd.f32 %v1755_v7, %v1467_v50  ;;  %v1786_v5 = vpop.f32.mrb[97].mxu0 }
 0x1c0   : > { %v1787_v8 = vpop.f32.mrb[98].mxu0 }
 0x1c1   : > { %v2639_v57 = vpack.c.bf16 %v1887_v54, %v1887_v54  ;;  %v1888_v59 = vmax.f32 %v1756_v55, 0.0  ;;  %v1789_v9 = vpop.f32.mrb[99].mxu0 }
 0x1c2   : > { %v1471_v60 = vpop.f32.mrb[84].mxu1 }
 0x1c3   : > { %2208 = vst.msk [vmem:[%s3378_s24 + $0xa0] sm:$0xf] %vm2167_vm2, %v2639_v57  ;;  %v2640_v61 = vpack.c.bf16 %v1888_v59, %v1888_v59  ;;  %v1472_v63 = vadd.f32 %v3361_v26, %v1471_v60  ;;  %v1473_v62 = vpop.f32.mrb[85].mxu1 }
 0x1c4   : > { %v1474_v0 = vpop.f32.mrb[86].mxu1 }
 0x1c5   : > { %2209 = vst.msk [vmem:[%s3378_s24 + $0xa4] sm:$0xf] %vm2167_vm2, %v2640_v61  ;;  %v1761_v1 = vadd.f32 %v1760_v19, %v1472_v63  ;;  %v1475_v2 = vadd.f32 %v3361_v26, %v1474_v0  ;;  %v1476_v3 = vpop.f32.mrb[87].mxu1 }
 0x1c6   : > { %v1792_v20 = vpop.f32.mrb[100].mxu0 }
 0x1c7   : > { %v1889_v6 = vmax.f32 %v1761_v1, 0.0  ;;  %v1764_v7 = vadd.f32 %v1763_v23, %v1475_v2  ;;  %v1794_v21 = vpop.f32.mrb[101].mxu0 }
 0x1c8   : > { %v1795_v25 = vpop.f32.mrb[102].mxu0 }
 0x1c9   : > { %v2641_v10 = vpack.c.bf16 %v1889_v6, %v1889_v6  ;;  %v1890_v11 = vmax.f32 %v1764_v7, 0.0  ;;  %v1797_v27 = vpop.f32.mrb[103].mxu0 }
 0x1ca   : > { %v1479_v12 = vpop.f32.mrb[88].mxu1 }
 0x1cb   : > { %2210 = vst.msk [vmem:[%s3378_s24 + $0xa8] sm:$0xf] %vm2167_vm2, %v2641_v10  ;;  %v2642_v13 = vpack.c.bf16 %v1890_v11, %v1890_v11  ;;  %v1480_v14 = vadd.f32 %v3361_v26, %v1479_v12  ;;  %v1481_v15 = vpop.f32.mrb[89].mxu1 }
 0x1cc   : > { %v1482_v16 = vpop.f32.mrb[90].mxu1 }
 0x1cd   : > { %2211 = vst.msk [vmem:[%s3378_s24 + $0xac] sm:$0xf] %vm2167_vm2, %v2642_v13  ;;  %v1769_v17 = vadd.f32 %v1768_v36, %v1480_v14  ;;  %v1483_v18 = vadd.f32 %v3361_v26, %v1482_v16  ;;  %v1484_v19 = vpop.f32.mrb[91].mxu1 }
 0x1ce   : > { %v1800_v38 = vpop.f32.mrb[104].mxu0 }
 0x1cf   : > { %v1891_v22 = vmax.f32 %v1769_v17, 0.0  ;;  %v1772_v23 = vadd.f32 %v1771_v37, %v1483_v18  ;;  %v1802_v39 = vpop.f32.mrb[105].mxu0 }
 0x1d0   : > { %v1803_v41 = vpop.f32.mrb[106].mxu0 }
 0x1d1   : > { %v2643_v28 = vpack.c.bf16 %v1891_v22, %v1891_v22  ;;  %v1892_v24 = vmax.f32 %v1772_v23, 0.0  ;;  %v1805_v43 = vpop.f32.mrb[107].mxu0 }
 0x1d2   : > { %v1487_v29 = vpop.f32.mrb[92].mxu1 }
 0x1d3   : > { %2212 = vst.msk [vmem:[%s3378_s24 + $0xb0] sm:$0xf] %vm2167_vm2, %v2643_v28  ;;  %v2644_v30 = vpack.c.bf16 %v1892_v24, %v1892_v24  ;;  %v1488_v31 = vadd.f32 %v3361_v26, %v1487_v29  ;;  %v1489_v32 = vpop.f32.mrb[93].mxu1 }
 0x1d4   : > { %v1490_v33 = vpop.f32.mrb[94].mxu1  ;;  %v3560_v32 = vld [vmem:[%s3605_s2] ss:$0 sm:$0xff] }
 0x1d5   : > { %2213 = vst.msk [vmem:[%s3378_s24 + $0xb4] sm:$0xf] %vm2167_vm2, %v2644_v30  ;;  %v1777_v34 = vadd.f32 %v1776_v52, %v1488_v31  ;;  %v1491_v35 = vadd.f32 %v3361_v26, %v1490_v33  ;;  %v1492_v36 = vpop.f32.mrb[95].mxu1 }
 0x1d6   : > { %v1808_v53 = vpop.f32.mrb[108].mxu0 }
 0x1d7   : > { %v1893_v40 = vmax.f32 %v1777_v34, 0.0  ;;  %v1780_v37 = vadd.f32 %v1779_v56, %v1491_v35  ;;  %v1810_v54 = vpop.f32.mrb[109].mxu0 }
 0x1d8   : > { %v1811_v58 = vpop.f32.mrb[110].mxu0 }
 0x1d9   : > { %v2645_v44 = vpack.c.bf16 %v1893_v40, %v1893_v40  ;;  %v1894_v45 = vmax.f32 %v1780_v37, 0.0  ;;  %v1813_v57 = vpop.f32.mrb[111].mxu0 }
 0x1da   : > { %v1495_v42 = vpop.f32.mrb[96].mxu1 }
 0x1db   : > { %2214 = vst.msk [vmem:[%s3378_s24 + $0xb8] sm:$0xf] %vm2167_vm2, %v2645_v44  ;;  %v2646_v46 = vpack.c.bf16 %v1894_v45, %v1894_v45  ;;  %v1496_v47 = vadd.f32 %v3361_v26, %v1495_v42  ;;  %v1497_v48 = vpop.f32.mrb[97].mxu1 }
 0x1dc   : > { %v1498_v49 = vpop.f32.mrb[98].mxu1 }
 0x1dd   : > { %2215 = vst.msk [vmem:[%s3378_s24 + $0xbc] sm:$0xf] %vm2167_vm2, %v2646_v46  ;;  %v1785_v50 = vadd.f32 %v1784_v4, %v1496_v47  ;;  %v1499_v51 = vadd.f32 %v3361_v26, %v1498_v49  ;;  %v1500_v52 = vpop.f32.mrb[99].mxu1 }
 0x1de   : > { %v1816_v5 = vpop.f32.mrb[112].mxu0 }
 0x1df   : > { %v1895_v55 = vmax.f32 %v1785_v50, 0.0  ;;  %v1788_v56 = vadd.f32 %v1787_v8, %v1499_v51  ;;  %v1818_v6 = vpop.f32.mrb[113].mxu0 }
 0x1e0   : > { %v1819_v9 = vpop.f32.mrb[114].mxu0 }
 0x1e1   : > { %v2647_v59 = vpack.c.bf16 %v1895_v55, %v1895_v55  ;;  %v1896_v60 = vmax.f32 %v1788_v56, 0.0  ;;  %v1821_v10 = vpop.f32.mrb[115].mxu0 }
 0x1e2   : > { %v1503_v61 = vpop.f32.mrb[100].mxu1 }
 0x1e3   : > { %2216 = vst.msk [vmem:[%s3378_s24 + $0xc0] sm:$0xf] %vm2167_vm2, %v2647_v59  ;;  %v2648_v63 = vpack.c.bf16 %v1896_v60, %v1896_v60  ;;  %v1504_v62 = vadd.f32 %v3361_v26, %v1503_v61  ;;  %v1505_v0 = vpop.f32.mrb[101].mxu1 }
 0x1e4   : > { %v1506_v1 = vpop.f32.mrb[102].mxu1 }
 0x1e5   : > { %2217 = vst.msk [vmem:[%s3378_s24 + $0xc4] sm:$0xf] %vm2167_vm2, %v2648_v63  ;;  %v1793_v2 = vadd.f32 %v1792_v20, %v1504_v62  ;;  %v1507_v3 = vadd.f32 %v3361_v26, %v1506_v1  ;;  %v1508_v4 = vpop.f32.mrb[103].mxu1 }
 0x1e6   : > { %v1824_v21 = vpop.f32.mrb[116].mxu0 }
 0x1e7   : > { %v1897_v7 = vmax.f32 %v1793_v2, 0.0  ;;  %v1796_v8 = vadd.f32 %v1795_v25, %v1507_v3  ;;  %v1826_v22 = vpop.f32.mrb[117].mxu0 }
 0x1e8   : > { %v1827_v27 = vpop.f32.mrb[118].mxu0 }
 0x1e9   : > { %v2649_v11 = vpack.c.bf16 %v1897_v7, %v1897_v7  ;;  %v1898_v12 = vmax.f32 %v1796_v8, 0.0  ;;  %v1829_v28 = vpop.f32.mrb[119].mxu0 }
 0x1ea   : > { %v1511_v13 = vpop.f32.mrb[104].mxu1 }
 0x1eb   : > { %2218 = vst.msk [vmem:[%s3378_s24 + $0xc8] sm:$0xf] %vm2167_vm2, %v2649_v11  ;;  %v2650_v14 = vpack.c.bf16 %v1898_v12, %v1898_v12  ;;  %v1512_v15 = vadd.f32 %v3361_v26, %v1511_v13  ;;  %v1513_v16 = vpop.f32.mrb[105].mxu1 }
 0x1ec   : > { %v1514_v17 = vpop.f32.mrb[106].mxu1 }
 0x1ed   : > { %2219 = vst.msk [vmem:[%s3378_s24 + $0xcc] sm:$0xf] %vm2167_vm2, %v2650_v14  ;;  %v1801_v18 = vadd.f32 %v1800_v38, %v1512_v15  ;;  %v1515_v19 = vadd.f32 %v3361_v26, %v1514_v17  ;;  %v1516_v20 = vpop.f32.mrb[107].mxu1 }
 0x1ee   : > { %v1832_v39 = vpop.f32.mrb[120].mxu0 }
 0x1ef   : > { %v1899_v23 = vmax.f32 %v1801_v18, 0.0  ;;  %v1804_v25 = vadd.f32 %v1803_v41, %v1515_v19  ;;  %v1834_v40 = vpop.f32.mrb[121].mxu0 }
 0x1f0   : > { %v1835_v43 = vpop.f32.mrb[122].mxu0 }
 0x1f1   : > { %v2651_v24 = vpack.c.bf16 %v1899_v23, %v1899_v23  ;;  %v1900_v29 = vmax.f32 %v1804_v25, 0.0  ;;  %v1837_v44 = vpop.f32.mrb[123].mxu0 }
 0x1f2   : > { %v1519_v30 = vpop.f32.mrb[108].mxu1 }
 0x1f3   : > { %2220 = vst.msk [vmem:[%s3378_s24 + $0xd0] sm:$0xf] %vm2167_vm2, %v2651_v24  ;;  %v2652_v31 = vpack.c.bf16 %v1900_v29, %v1900_v29  ;;  %v1520_v26 = vadd.f32 %v3560_v32, %v1519_v30  ;;  %v1521_v33 = vpop.f32.mrb[109].mxu1 }
 0x1f4   : > { %v1522_v34 = vpop.f32.mrb[110].mxu1 }
 0x1f5   : > { %2221 = vst.msk [vmem:[%s3378_s24 + $0xd4] sm:$0xf] %vm2167_vm2, %v2652_v31  ;;  %v1809_v35 = vadd.f32 %v1808_v53, %v1520_v26  ;;  %v1523_v36 = vadd.f32 %v3560_v32, %v1522_v34  ;;  %v1524_v38 = vpop.f32.mrb[111].mxu1 }
 0x1f6   : > { %v1840_v54 = vpop.f32.mrb[124].mxu0 }
 0x1f7   : > { %v1901_v37 = vmax.f32 %v1809_v35, 0.0  ;;  %v1812_v41 = vadd.f32 %v1811_v58, %v1523_v36  ;;  %v1842_v55 = vpop.f32.mrb[125].mxu0 }
 0x1f8   : > { %v1843_v57 = vpop.f32.mrb[126].mxu0 }
 0x1f9   : > { %v2653_v45 = vpack.c.bf16 %v1901_v37, %v1901_v37  ;;  %v1902_v42 = vmax.f32 %v1812_v41, 0.0  ;;  %v1845_v59 = vpop.f32.mrb[127].mxu0 }
 0x1fa   : > { %v1527_v46 = vpop.f32.mrb[112].mxu1 }
 0x1fb   : > { %2222 = vst.msk [vmem:[%s3378_s24 + $0xd8] sm:$0xf] %vm2167_vm2, %v2653_v45  ;;  %v2654_v47 = vpack.c.bf16 %v1902_v42, %v1902_v42  ;;  %v1528_v48 = vadd.f32 %v3560_v32, %v1527_v46  ;;  %v1529_v49 = vpop.f32.mrb[113].mxu1 }
 0x1fc   : > { %v1530_v50 = vpop.f32.mrb[114].mxu1 }
 0x1fd   : > { %2223 = vst.msk [vmem:[%s3378_s24 + $0xdc] sm:$0xf] %vm2167_vm2, %v2654_v47  ;;  %v1817_v51 = vadd.f32 %v1816_v5, %v1528_v48  ;;  %v1531_v52 = vadd.f32 %v3560_v32, %v1530_v50  ;;  %v1532_v53 = vpop.f32.mrb[115].mxu1 }
 0x1ff   : > { %v1903_v56 = vmax.f32 %v1817_v51, 0.0  ;;  %v1820_v58 = vadd.f32 %v1819_v9, %v1531_v52 }
 0x201   : > { %v2655_v60 = vpack.c.bf16 %v1903_v56, %v1903_v56  ;;  %v1904_v61 = vmax.f32 %v1820_v58, 0.0 }
 0x202   : > { %v1535_v63 = vpop.f32.mrb[116].mxu1 }
 0x203   : > { %2224 = vst.msk [vmem:[%s3378_s24 + $0xe0] sm:$0xf] %vm2167_vm2, %v2655_v60  ;;  %v2656_v62 = vpack.c.bf16 %v1904_v61, %v1904_v61  ;;  %v1536_v0 = vadd.f32 %v3560_v32, %v1535_v63  ;;  %v1537_v1 = vpop.f32.mrb[117].mxu1 }
 0x204   : > { %v1538_v2 = vpop.f32.mrb[118].mxu1 }
 0x205   : > { %2225 = vst.msk [vmem:[%s3378_s24 + $0xe4] sm:$0xf] %vm2167_vm2, %v2656_v62  ;;  %v1825_v3 = vadd.f32 %v1824_v21, %v1536_v0  ;;  %v1539_v4 = vadd.f32 %v3560_v32, %v1538_v2  ;;  %v1540_v5 = vpop.f32.mrb[119].mxu1 }
 0x207   : > { %v1905_v6 = vmax.f32 %v1825_v3, 0.0  ;;  %v1828_v7 = vadd.f32 %v1827_v27, %v1539_v4 }
 0x209   : > { %v2657_v8 = vpack.c.bf16 %v1905_v6, %v1905_v6  ;;  %v1906_v9 = vmax.f32 %v1828_v7, 0.0 }
 0x20a   : > { %v1543_v10 = vpop.f32.mrb[120].mxu1 }
 0x20b   : > { %2226 = vst.msk [vmem:[%s3378_s24 + $0xe8] sm:$0xf] %vm2167_vm2, %v2657_v8  ;;  %v2658_v11 = vpack.c.bf16 %v1906_v9, %v1906_v9  ;;  %v1544_v12 = vadd.f32 %v3560_v32, %v1543_v10  ;;  %v1545_v13 = vpop.f32.mrb[121].mxu1 }
 0x20c   : > { %v1546_v14 = vpop.f32.mrb[122].mxu1 }
 0x20d   : > { %2227 = vst.msk [vmem:[%s3378_s24 + $0xec] sm:$0xf] %vm2167_vm2, %v2658_v11  ;;  %v1833_v15 = vadd.f32 %v1832_v39, %v1544_v12  ;;  %v1547_v16 = vadd.f32 %v3560_v32, %v1546_v14  ;;  %v1548_v17 = vpop.f32.mrb[123].mxu1 }
 0x20f   : > { %v1907_v18 = vmax.f32 %v1833_v15, 0.0  ;;  %v1836_v19 = vadd.f32 %v1835_v43, %v1547_v16 }
 0x211   : > { %v2659_v20 = vpack.c.bf16 %v1907_v18, %v1907_v18  ;;  %v1908_v21 = vmax.f32 %v1836_v19, 0.0 }
 0x212   : > { %v1551_v22 = vpop.f32.mrb[124].mxu1 }
 0x213   : > { %2228 = vst.msk [vmem:[%s3378_s24 + $0xf0] sm:$0xf] %vm2167_vm2, %v2659_v20  ;;  %v2660_v23 = vpack.c.bf16 %v1908_v21, %v1908_v21  ;;  %v1552_v25 = vadd.f32 %v3560_v32, %v1551_v22  ;;  %v1553_v27 = vpop.f32.mrb[125].mxu1 }
 0x214   : > { %v1554_v28 = vpop.f32.mrb[126].mxu1 }
 0x215   : > { %2229 = vst.msk [vmem:[%s3378_s24 + $0xf4] sm:$0xf] %vm2167_vm2, %v2660_v23  ;;  %v1841_v24 = vadd.f32 %v1840_v54, %v1552_v25  ;;  %v1555_v29 = vadd.f32 %v3560_v32, %v1554_v28  ;;  %v1556_v30 = vpop.f32.mrb[127].mxu1 }
 0x217   : > { %v1909_v31 = vmax.f32 %v1841_v24, 0.0  ;;  %v1844_v26 = vadd.f32 %v1843_v57, %v1555_v29 }
 0x219   : > { %v2661_v33 = vpack.c.bf16 %v1909_v31, %v1909_v31  ;;  %v1910_v34 = vmax.f32 %v1844_v26, 0.0 }
 0x21b   : > { %2230 = vst.msk [vmem:[%s3378_s24 + $0xf8] sm:$0xf] %vm2167_vm2, %v2661_v33  ;;  %v2662_v35 = vpack.c.bf16 %v1910_v34, %v1910_v34 }
 0x21d   : > { %2231 = vst.msk [vmem:[%s3378_s24 + $0xfc] sm:$0xf] %vm2167_vm2, %v2662_v35 }
 0x21e PF: > { %s13_s14 = sadd.s32 1, %s3056_s14   ;;  %s3607_s12 = smov %s3052_s13 }
 0x21f   : > { %p10_p5 = scmp.ge.s32.totalorder %s13_s14, 6   ;;  %s3608_s13 = smov %s3610_s15 }
 0x221   :  { %12 = sbr.rel (!%p10_p5) target bundleno = 2 (0x2), region = 68 }

</bundles_post_ra>
